<compile_context>
chip_gen: v5e
topology: v5e:2x2
jax: 0.10.0
libtpu: 0.0.40
codegen_flags: <defaults>
</compile_context>

<pallas_src>
import jax
import jax.numpy as jnp
from jax.experimental import pallas as pl
from jax.experimental.pallas import tpu as pltpu


# ----------------------------------------------------------------------------
# Fused kernel: channel pooling + conv3x3 + conv5x5 + sigmoid  (Bt batch elems)
# ----------------------------------------------------------------------------
def _spatial_attention_kernel(params_ref, x_ref, o_ref, sum_ref, max_ref, y1_ref):
    Bt, C, H, W = x_ref.shape

    # Channel pooling; accumulate in f32 even for bf16/fp16 inputs.
    x = x_ref[...].astype(jnp.float32)            # (Bt, C, H, W)
    csum = jnp.sum(x, axis=1)                     # (Bt, H, W); 1/C folded into w1[avg]
    cmax = jnp.max(x, axis=1)                     # (Bt, H, W)

    # Zero-padded conv1 inputs live in VMEM scratch.  The zero border is
    # exactly PyTorch's zero-padding of conv1's input (the pooled maps).
    sum_ref[...] = jnp.zeros_like(sum_ref)
    max_ref[...] = jnp.zeros_like(max_ref)
    sum_ref[:, 1:1 + H, 1:1 + W] = csum
    max_ref[:, 1:1 + H, 1:1 + W] = cmax
    avg_p = sum_ref[...]                          # (Bt, H+2, W+2)
    max_p = max_ref[...]                          # (Bt, H+2, W+2)

    # Hoist the lane-direction (kx) shifts out of the ky loops: build the 3
    # kx-shifted copies once; each tap below is then a sublane-offset slice.
    avg_cols = [avg_p[:, :, kx:kx + W] for kx in range(3)]   # each (Bt, H+2, W)
    max_cols = [max_p[:, :, kx:kx + W] for kx in range(3)]

    # ---- Conv2d(2 -> 1, 3x3, padding=1) + bias, interior only ---------------
    # params[0:9]  : avg-channel weights (already scaled by 1/C), row-major
    # params[9:18] : max-channel weights
    # params[18]   : bias
    acc1 = jnp.full((Bt, H, W), params_ref[18], dtype=jnp.float32)
    for ky in range(3):
        for kx in range(3):
            acc1 = acc1 + params_ref[ky * 3 + kx] * avg_cols[kx][:, ky:ky + H, :]
            acc1 = acc1 + params_ref[9 + ky * 3 + kx] * max_cols[kx][:, ky:ky + H, :]

    # PyTorch zero-pads conv1's *output* before conv2: write the interior of a
    # zeroed (H+4, W+4) scratch (border stays exactly zero).
    y1_ref[...] = jnp.zeros_like(y1_ref)
    y1_ref[:, 2:2 + H, 2:2 + W] = acc1
    y1 = y1_ref[...]                              # (Bt, H+4, W+4)
    y1_cols = [y1[:, :, kx:kx + W] for kx in range(5)]       # each (Bt, H+4, W)

    # ---- Conv2d(1 -> 1, 5x5, padding=2) + bias + sigmoid ---------------------
    # params[19:44]: 5x5 weights (row-major),  params[44]: bias
    acc2 = jnp.full((Bt, H, W), params_ref[44], dtype=jnp.float32)
    for ky in range(5):
        for kx in range(5):
            acc2 = acc2 + params_ref[19 + ky * 5 + kx] * y1_cols[kx][:, ky:ky + H, :]

    o_ref[...] = jax.nn.sigmoid(acc2).astype(o_ref.dtype)


# ----------------------------------------------------------------------------
# Batch-block size: biggest Bt under a per-block VMEM budget, keeping >= 2
# grid steps when B >= 2 so v7x's two TensorCores both get work.
# ----------------------------------------------------------------------------
def _choose_bt(B, C, H, W, itemsize):
    lanes = -(-W // 128) * 128                    # lane padding of the last dim
    subl = -(-H // 8) * 8                         # sublane padding
    per_batch = max(1, C * subl * lanes * itemsize)
    budget = 4 * 1024 * 1024                      # per input block (double-buffered)
    cap = max(1, min(8, budget // per_batch))
    for cand in range(min(cap, B), 0, -1):
        if B % cand == 0 and (B < 2 or B // cand >= 2):
            return cand
    return 1


# ----------------------------------------------------------------------------
# Wrapper: NCHW in, NCHW out (matches the PyTorch module)
# ----------------------------------------------------------------------------
def spatial_attention_forward(params, x):
    """x: (B, C, H, W) -> (B, 1, H, W), dtype preserved."""
    B, C, H, W = x.shape

    w1 = params["w1"].astype(jnp.float32)         # (2,3,3): ch 0 = avg, ch 1 = max
    flat = jnp.concatenate([
        (w1[0] / C).reshape(-1),                  # fold mean's 1/C into the weights
        w1[1].reshape(-1),
        params["b1"].reshape(-1).astype(jnp.float32),
        params["w2"].reshape(-1).astype(jnp.float32),
        params["b2"].reshape(-1).astype(jnp.float32),
    ])                                            # (45,) scalar vector -> SMEM

    Bt = _choose_bt(B, C, H, W, x.dtype.itemsize)

    out = pl.pallas_call(
        _spatial_attention_kernel,
        out_shape=jax.ShapeDtypeStruct((B, H, W), x.dtype),
        grid=(B // Bt,),
        in_specs=[
            pl.BlockSpec(memory_space=pltpu.MemorySpace.SMEM),        # params
            pl.BlockSpec((Bt, C, H, W), lambda b: (b, 0, 0, 0)),      # x, native dtype
        ],
        out_specs=pl.BlockSpec((Bt, H, W), lambda b: (b, 0, 0)),
        scratch_shapes=[
            pltpu.VMEM((Bt, H + 2, W + 2), jnp.float32),  # zero-padded channel-sum map
            pltpu.VMEM((Bt, H + 2, W + 2), jnp.float32),  # zero-padded channel-max map
            pltpu.VMEM((Bt, H + 4, W + 4), jnp.float32),  # zero-padded conv1 output
        ],
        compiler_params=pltpu.CompilerParams(
            dimension_semantics=("parallel",),
            vmem_limit_bytes=32 * 1024 * 1024,
        ),
    )(flat, x)
    # TODO(synk): for W << 128, pack batch items (or H row-strips) side-by-side
    # along the lane axis (with per-item zero halos) so vregs/stores are
    # lane-dense - the biggest remaining lever at tiny spatial widths.
    # TODO(synk): for very large C or H*W, add an innermost "arbitrary" grid
    # axis over C-chunks (VMEM sum/max accumulators via pl.when) and/or H
    # row-strips with a 1/2-row halo to bound per-step VMEM (v7x: 64 MiB).
    # TODO(synk): when B == 1 on v7x, add a second "parallel" grid axis over H
    # row-tiles so both TensorCores have work.
    return out.reshape(B, 1, H, W)


# ----------------------------------------------------------------------------
# Pure-JAX reference (for correctness validation only)
# ----------------------------------------------------------------------------
def _reference(params, x):
    avg = jnp.mean(x, axis=1, keepdims=True)
    mx = jnp.max(x, axis=1, keepdims=True)
    h = jnp.concatenate([avg, mx], axis=1)                       # (B,2,H,W)
    h = jax.lax.conv_general_dilated(
        h, params["w1"][None], (1, 1), ((1, 1), (1, 1)),
        dimension_numbers=("NCHW", "OIHW", "NCHW"))
    h = h + params["b1"].reshape(1, 1, 1, 1)
    h = jax.lax.conv_general_dilated(
        h, params["w2"][None, None], (1, 1), ((2, 2), (2, 2)),
        dimension_numbers=("NCHW", "OIHW", "NCHW"))
    h = h + params["b2"].reshape(1, 1, 1, 1)
    return jax.nn.sigmoid(h)


if __name__ == "__main__":
    B, C, H, W = 2, 4, 16, 16

    key = jax.random.PRNGKey(0)
    k1, k2, k3, k4, k5 = jax.random.split(key, 5)
    params = {
        "w1": (0.1 * jax.random.normal(k1, (2, 3, 3))).astype(jnp.float32),
        "b1": (0.1 * jax.random.normal(k2, (1,))).astype(jnp.float32),
        "w2": (0.1 * jax.random.normal(k3, (5, 5))).astype(jnp.float32),
        "b2": (0.1 * jax.random.normal(k4, (1,))).astype(jnp.float32),
    }
    x = jax.random.normal(k5, (B, C, H, W), jnp.float32)

    fwd = jax.jit(spatial_attention_forward)
    out = fwd(params, x)
    jax.block_until_ready(out)

    assert out.shape == (B, 1, H, W)
    ref = _reference(params, x)
    err = float(jnp.max(jnp.abs(out.astype(jnp.float32) - ref)))
    assert jnp.allclose(out.astype(jnp.float32), ref, atol=1e-4, rtol=1e-4), \
        f"max abs err {err}"
    print("KERNEL_OK")
</pallas_src>

<mosaic_0001>
module attributes {stable_mosaic.version = 11 : i64} {
  func.func @_spatial_attention_kernel(%arg0: i32, %arg1: memref<45xf32, #tpu.memory_space<smem>>, %arg2: memref<1x4x16x16xf32, #tpu.memory_space<vmem>>, %arg3: memref<1x16x16xf32, #tpu.memory_space<vmem>>, %arg4: memref<1x18x18xf32, #tpu.memory_space<vmem>>, %arg5: memref<1x18x18xf32, #tpu.memory_space<vmem>>, %arg6: memref<1x20x20xf32, #tpu.memory_space<vmem>>) attributes {dimension_semantics = [#tpu.dimension_semantics<parallel>], iteration_bounds = array<i64: 2>, scalar_prefetch = 0 : i64, scratch_operands = 3 : i64, tpu.core_type = #tpu.core_type<tc>, window_params = [{transform_indices = @transform_0, window_bounds = array<i64: 45>}, {transform_indices = @transform_1, window_bounds = array<i64: 1, 4, 16, 16>}, {transform_indices = @transform_2, window_bounds = array<i64: 1, 16, 16>}]} {
    %c0 = arith.constant 0 : index
    %c0_0 = arith.constant 0 : index
    %c0_1 = arith.constant 0 : index
    %c0_2 = arith.constant 0 : index
    %0 = vector.load %arg2[%c0, %c0_0, %c0_1, %c0_2] : memref<1x4x16x16xf32, #tpu.memory_space<vmem>>, vector<1x4x16x16xf32>
    %cst = arith.constant dense<0.000000e+00> : vector<1x16x16xf32>
    %1 = vector.multi_reduction <add>, %0, %cst [1] : vector<1x4x16x16xf32> to vector<1x16x16xf32>
    %cst_3 = arith.constant dense<0xFF800000> : vector<1x16x16xf32>
    %2 = vector.multi_reduction <maximumf>, %0, %cst_3 [1] : vector<1x4x16x16xf32> to vector<1x16x16xf32>
    %cst_4 = arith.constant 0.000000e+00 : f32
    %3 = vector.broadcast %cst_4 : f32 to vector<1x18x18xf32>
    %c0_5 = arith.constant 0 : index
    %c0_6 = arith.constant 0 : index
    %c0_7 = arith.constant 0 : index
    %4 = vector.load %arg4[%c0_5, %c0_6, %c0_7] : memref<1x18x18xf32, #tpu.memory_space<vmem>>, vector<1x18x18xf32>
    tpu.vector_store %arg4[%c0_5, %c0_6, %c0_7], %3 {strides = array<i32>} : memref<1x18x18xf32, #tpu.memory_space<vmem>>, vector<1x18x18xf32>,
    %cst_8 = arith.constant 0.000000e+00 : f32
    %5 = vector.broadcast %cst_8 : f32 to vector<1x18x18xf32>
    %c0_9 = arith.constant 0 : index
    %c0_10 = arith.constant 0 : index
    %c0_11 = arith.constant 0 : index
    %6 = vector.load %arg5[%c0_9, %c0_10, %c0_11] : memref<1x18x18xf32, #tpu.memory_space<vmem>>, vector<1x18x18xf32>
    tpu.vector_store %arg5[%c0_9, %c0_10, %c0_11], %5 {strides = array<i32>} : memref<1x18x18xf32, #tpu.memory_space<vmem>>, vector<1x18x18xf32>,
    %c0_12 = arith.constant 0 : index
    %c1 = arith.constant 1 : index
    %c1_13 = arith.constant 1 : index
    %7 = vector.load %arg4[%c0_12, %c1, %c1_13] : memref<1x18x18xf32, #tpu.memory_space<vmem>>, vector<1x16x16xf32>
    tpu.vector_store %arg4[%c0_12, %c1, %c1_13], %1 {strides = array<i32>} : memref<1x18x18xf32, #tpu.memory_space<vmem>>, vector<1x16x16xf32>,
    %c0_14 = arith.constant 0 : index
    %c1_15 = arith.constant 1 : index
    %c1_16 = arith.constant 1 : index
    %8 = vector.load %arg5[%c0_14, %c1_15, %c1_16] : memref<1x18x18xf32, #tpu.memory_space<vmem>>, vector<1x16x16xf32>
    tpu.vector_store %arg5[%c0_14, %c1_15, %c1_16], %2 {strides = array<i32>} : memref<1x18x18xf32, #tpu.memory_space<vmem>>, vector<1x16x16xf32>,
    %c0_17 = arith.constant 0 : index
    %c0_18 = arith.constant 0 : index
    %c0_19 = arith.constant 0 : index
    %9 = vector.load %arg4[%c0_17, %c0_18, %c0_19] : memref<1x18x18xf32, #tpu.memory_space<vmem>>, vector<1x18x18xf32>
    %c0_20 = arith.constant 0 : index
    %c0_21 = arith.constant 0 : index
    %c0_22 = arith.constant 0 : index
    %10 = vector.load %arg5[%c0_20, %c0_21, %c0_22] : memref<1x18x18xf32, #tpu.memory_space<vmem>>, vector<1x18x18xf32>
    %11 = vector.extract_strided_slice %9 {offsets = [0, 0, 0], sizes = [1, 18, 16], strides = [1, 1, 1]} : vector<1x18x18xf32> to vector<1x18x16xf32>
    %12 = vector.extract_strided_slice %9 {offsets = [0, 0, 1], sizes = [1, 18, 16], strides = [1, 1, 1]} : vector<1x18x18xf32> to vector<1x18x16xf32>
    %13 = vector.extract_strided_slice %9 {offsets = [0, 0, 2], sizes = [1, 18, 16], strides = [1, 1, 1]} : vector<1x18x18xf32> to vector<1x18x16xf32>
    %14 = vector.extract_strided_slice %10 {offsets = [0, 0, 0], sizes = [1, 18, 16], strides = [1, 1, 1]} : vector<1x18x18xf32> to vector<1x18x16xf32>
    %15 = vector.extract_strided_slice %10 {offsets = [0, 0, 1], sizes = [1, 18, 16], strides = [1, 1, 1]} : vector<1x18x18xf32> to vector<1x18x16xf32>
    %16 = vector.extract_strided_slice %10 {offsets = [0, 0, 2], sizes = [1, 18, 16], strides = [1, 1, 1]} : vector<1x18x18xf32> to vector<1x18x16xf32>
    %c18 = arith.constant 18 : index
    %17 = memref.load %arg1[%c18] : memref<45xf32, #tpu.memory_space<smem>>
    %18 = vector.broadcast %17 : f32 to vector<1x16x16xf32>
    %c0_23 = arith.constant 0 : index
    %19 = memref.load %arg1[%c0_23] : memref<45xf32, #tpu.memory_space<smem>>
    %20 = vector.extract_strided_slice %11 {offsets = [0, 0, 0], sizes = [1, 16, 16], strides = [1, 1, 1]} : vector<1x18x16xf32> to vector<1x16x16xf32>
    %21 = vector.broadcast %19 : f32 to vector<1x16x16xf32>
    %22 = arith.mulf %21, %20 : vector<1x16x16xf32>
    %23 = arith.addf %18, %22 : vector<1x16x16xf32>
    %c9 = arith.constant 9 : index
    %24 = memref.load %arg1[%c9] : memref<45xf32, #tpu.memory_space<smem>>
    %25 = vector.extract_strided_slice %14 {offsets = [0, 0, 0], sizes = [1, 16, 16], strides = [1, 1, 1]} : vector<1x18x16xf32> to vector<1x16x16xf32>
    %26 = vector.broadcast %24 : f32 to vector<1x16x16xf32>
    %27 = arith.mulf %26, %25 : vector<1x16x16xf32>
    %28 = arith.addf %23, %27 : vector<1x16x16xf32>
    %c1_24 = arith.constant 1 : index
    %29 = memref.load %arg1[%c1_24] : memref<45xf32, #tpu.memory_space<smem>>
    %30 = vector.extract_strided_slice %12 {offsets = [0, 0, 0], sizes = [1, 16, 16], strides = [1, 1, 1]} : vector<1x18x16xf32> to vector<1x16x16xf32>
    %31 = vector.broadcast %29 : f32 to vector<1x16x16xf32>
    %32 = arith.mulf %31, %30 : vector<1x16x16xf32>
    %33 = arith.addf %28, %32 : vector<1x16x16xf32>
    %c10 = arith.constant 10 : index
    %34 = memref.load %arg1[%c10] : memref<45xf32, #tpu.memory_space<smem>>
    %35 = vector.extract_strided_slice %15 {offsets = [0, 0, 0], sizes = [1, 16, 16], strides = [1, 1, 1]} : vector<1x18x16xf32> to vector<1x16x16xf32>
    %36 = vector.broadcast %34 : f32 to vector<1x16x16xf32>
    %37 = arith.mulf %36, %35 : vector<1x16x16xf32>
    %38 = arith.addf %33, %37 : vector<1x16x16xf32>
    %c2 = arith.constant 2 : index
    %39 = memref.load %arg1[%c2] : memref<45xf32, #tpu.memory_space<smem>>
    %40 = vector.extract_strided_slice %13 {offsets = [0, 0, 0], sizes = [1, 16, 16], strides = [1, 1, 1]} : vector<1x18x16xf32> to vector<1x16x16xf32>
    %41 = vector.broadcast %39 : f32 to vector<1x16x16xf32>
    %42 = arith.mulf %41, %40 : vector<1x16x16xf32>
    %43 = arith.addf %38, %42 : vector<1x16x16xf32>
    %c11 = arith.constant 11 : index
    %44 = memref.load %arg1[%c11] : memref<45xf32, #tpu.memory_space<smem>>
    %45 = vector.extract_strided_slice %16 {offsets = [0, 0, 0], sizes = [1, 16, 16], strides = [1, 1, 1]} : vector<1x18x16xf32> to vector<1x16x16xf32>
    %46 = vector.broadcast %44 : f32 to vector<1x16x16xf32>
    %47 = arith.mulf %46, %45 : vector<1x16x16xf32>
    %48 = arith.addf %43, %47 : vector<1x16x16xf32>
    %c3 = arith.constant 3 : index
    %49 = memref.load %arg1[%c3] : memref<45xf32, #tpu.memory_space<smem>>
    %50 = vector.extract_strided_slice %11 {offsets = [0, 1, 0], sizes = [1, 16, 16], strides = [1, 1, 1]} : vector<1x18x16xf32> to vector<1x16x16xf32>
    %51 = vector.broadcast %49 : f32 to vector<1x16x16xf32>
    %52 = arith.mulf %51, %50 : vector<1x16x16xf32>
    %53 = arith.addf %48, %52 : vector<1x16x16xf32>
    %c12 = arith.constant 12 : index
    %54 = memref.load %arg1[%c12] : memref<45xf32, #tpu.memory_space<smem>>
    %55 = vector.extract_strided_slice %14 {offsets = [0, 1, 0], sizes = [1, 16, 16], strides = [1, 1, 1]} : vector<1x18x16xf32> to vector<1x16x16xf32>
    %56 = vector.broadcast %54 : f32 to vector<1x16x16xf32>
    %57 = arith.mulf %56, %55 : vector<1x16x16xf32>
    %58 = arith.addf %53, %57 : vector<1x16x16xf32>
    %c4 = arith.constant 4 : index
    %59 = memref.load %arg1[%c4] : memref<45xf32, #tpu.memory_space<smem>>
    %60 = vector.extract_strided_slice %12 {offsets = [0, 1, 0], sizes = [1, 16, 16], strides = [1, 1, 1]} : vector<1x18x16xf32> to vector<1x16x16xf32>
    %61 = vector.broadcast %59 : f32 to vector<1x16x16xf32>
    %62 = arith.mulf %61, %60 : vector<1x16x16xf32>
    %63 = arith.addf %58, %62 : vector<1x16x16xf32>
    %c13 = arith.constant 13 : index
    %64 = memref.load %arg1[%c13] : memref<45xf32, #tpu.memory_space<smem>>
    %65 = vector.extract_strided_slice %15 {offsets = [0, 1, 0], sizes = [1, 16, 16], strides = [1, 1, 1]} : vector<1x18x16xf32> to vector<1x16x16xf32>
    %66 = vector.broadcast %64 : f32 to vector<1x16x16xf32>
    %67 = arith.mulf %66, %65 : vector<1x16x16xf32>
    %68 = arith.addf %63, %67 : vector<1x16x16xf32>
    %c5 = arith.constant 5 : index
    %69 = memref.load %arg1[%c5] : memref<45xf32, #tpu.memory_space<smem>>
    %70 = vector.extract_strided_slice %13 {offsets = [0, 1, 0], sizes = [1, 16, 16], strides = [1, 1, 1]} : vector<1x18x16xf32> to vector<1x16x16xf32>
    %71 = vector.broadcast %69 : f32 to vector<1x16x16xf32>
    %72 = arith.mulf %71, %70 : vector<1x16x16xf32>
    %73 = arith.addf %68, %72 : vector<1x16x16xf32>
    %c14 = arith.constant 14 : index
    %74 = memref.load %arg1[%c14] : memref<45xf32, #tpu.memory_space<smem>>
    %75 = vector.extract_strided_slice %16 {offsets = [0, 1, 0], sizes = [1, 16, 16], strides = [1, 1, 1]} : vector<1x18x16xf32> to vector<1x16x16xf32>
    %76 = vector.broadcast %74 : f32 to vector<1x16x16xf32>
    %77 = arith.mulf %76, %75 : vector<1x16x16xf32>
    %78 = arith.addf %73, %77 : vector<1x16x16xf32>
    %c6 = arith.constant 6 : index
    %79 = memref.load %arg1[%c6] : memref<45xf32, #tpu.memory_space<smem>>
    %80 = vector.extract_strided_slice %11 {offsets = [0, 2, 0], sizes = [1, 16, 16], strides = [1, 1, 1]} : vector<1x18x16xf32> to vector<1x16x16xf32>
    %81 = vector.broadcast %79 : f32 to vector<1x16x16xf32>
    %82 = arith.mulf %81, %80 : vector<1x16x16xf32>
    %83 = arith.addf %78, %82 : vector<1x16x16xf32>
    %c15 = arith.constant 15 : index
    %84 = memref.load %arg1[%c15] : memref<45xf32, #tpu.memory_space<smem>>
    %85 = vector.extract_strided_slice %14 {offsets = [0, 2, 0], sizes = [1, 16, 16], strides = [1, 1, 1]} : vector<1x18x16xf32> to vector<1x16x16xf32>
    %86 = vector.broadcast %84 : f32 to vector<1x16x16xf32>
    %87 = arith.mulf %86, %85 : vector<1x16x16xf32>
    %88 = arith.addf %83, %87 : vector<1x16x16xf32>
    %c7 = arith.constant 7 : index
    %89 = memref.load %arg1[%c7] : memref<45xf32, #tpu.memory_space<smem>>
    %90 = vector.extract_strided_slice %12 {offsets = [0, 2, 0], sizes = [1, 16, 16], strides = [1, 1, 1]} : vector<1x18x16xf32> to vector<1x16x16xf32>
    %91 = vector.broadcast %89 : f32 to vector<1x16x16xf32>
    %92 = arith.mulf %91, %90 : vector<1x16x16xf32>
    %93 = arith.addf %88, %92 : vector<1x16x16xf32>
    %c16 = arith.constant 16 : index
    %94 = memref.load %arg1[%c16] : memref<45xf32, #tpu.memory_space<smem>>
    %95 = vector.extract_strided_slice %15 {offsets = [0, 2, 0], sizes = [1, 16, 16], strides = [1, 1, 1]} : vector<1x18x16xf32> to vector<1x16x16xf32>
    %96 = vector.broadcast %94 : f32 to vector<1x16x16xf32>
    %97 = arith.mulf %96, %95 : vector<1x16x16xf32>
    %98 = arith.addf %93, %97 : vector<1x16x16xf32>
    %c8 = arith.constant 8 : index
    %99 = memref.load %arg1[%c8] : memref<45xf32, #tpu.memory_space<smem>>
    %100 = vector.extract_strided_slice %13 {offsets = [0, 2, 0], sizes = [1, 16, 16], strides = [1, 1, 1]} : vector<1x18x16xf32> to vector<1x16x16xf32>
    %101 = vector.broadcast %99 : f32 to vector<1x16x16xf32>
    %102 = arith.mulf %101, %100 : vector<1x16x16xf32>
    %103 = arith.addf %98, %102 : vector<1x16x16xf32>
    %c17 = arith.constant 17 : index
    %104 = memref.load %arg1[%c17] : memref<45xf32, #tpu.memory_space<smem>>
    %105 = vector.extract_strided_slice %16 {offsets = [0, 2, 0], sizes = [1, 16, 16], strides = [1, 1, 1]} : vector<1x18x16xf32> to vector<1x16x16xf32>
    %106 = vector.broadcast %104 : f32 to vector<1x16x16xf32>
    %107 = arith.mulf %106, %105 : vector<1x16x16xf32>
    %108 = arith.addf %103, %107 : vector<1x16x16xf32>
    %cst_25 = arith.constant 0.000000e+00 : f32
    %109 = vector.broadcast %cst_25 : f32 to vector<1x20x20xf32>
    %c0_26 = arith.constant 0 : index
    %c0_27 = arith.constant 0 : index
    %c0_28 = arith.constant 0 : index
    %110 = vector.load %arg6[%c0_26, %c0_27, %c0_28] : memref<1x20x20xf32, #tpu.memory_space<vmem>>, vector<1x20x20xf32>
    tpu.vector_store %arg6[%c0_26, %c0_27, %c0_28], %109 {strides = array<i32>} : memref<1x20x20xf32, #tpu.memory_space<vmem>>, vector<1x20x20xf32>,
    %c0_29 = arith.constant 0 : index
    %c2_30 = arith.constant 2 : index
    %c2_31 = arith.constant 2 : index
    %111 = vector.load %arg6[%c0_29, %c2_30, %c2_31] : memref<1x20x20xf32, #tpu.memory_space<vmem>>, vector<1x16x16xf32>
    tpu.vector_store %arg6[%c0_29, %c2_30, %c2_31], %108 {strides = array<i32>} : memref<1x20x20xf32, #tpu.memory_space<vmem>>, vector<1x16x16xf32>,
    %c0_32 = arith.constant 0 : index
    %c0_33 = arith.constant 0 : index
    %c0_34 = arith.constant 0 : index
    %112 = vector.load %arg6[%c0_32, %c0_33, %c0_34] : memref<1x20x20xf32, #tpu.memory_space<vmem>>, vector<1x20x20xf32>
    %113 = vector.extract_strided_slice %112 {offsets = [0, 0, 0], sizes = [1, 20, 16], strides = [1, 1, 1]} : vector<1x20x20xf32> to vector<1x20x16xf32>
    %114 = vector.extract_strided_slice %112 {offsets = [0, 0, 1], sizes = [1, 20, 16], strides = [1, 1, 1]} : vector<1x20x20xf32> to vector<1x20x16xf32>
    %115 = vector.extract_strided_slice %112 {offsets = [0, 0, 2], sizes = [1, 20, 16], strides = [1, 1, 1]} : vector<1x20x20xf32> to vector<1x20x16xf32>
    %116 = vector.extract_strided_slice %112 {offsets = [0, 0, 3], sizes = [1, 20, 16], strides = [1, 1, 1]} : vector<1x20x20xf32> to vector<1x20x16xf32>
    %117 = vector.extract_strided_slice %112 {offsets = [0, 0, 4], sizes = [1, 20, 16], strides = [1, 1, 1]} : vector<1x20x20xf32> to vector<1x20x16xf32>
    %c44 = arith.constant 44 : index
    %118 = memref.load %arg1[%c44] : memref<45xf32, #tpu.memory_space<smem>>
    %119 = vector.broadcast %118 : f32 to vector<1x16x16xf32>
    %c19 = arith.constant 19 : index
    %120 = memref.load %arg1[%c19] : memref<45xf32, #tpu.memory_space<smem>>
    %121 = vector.extract_strided_slice %113 {offsets = [0, 0, 0], sizes = [1, 16, 16], strides = [1, 1, 1]} : vector<1x20x16xf32> to vector<1x16x16xf32>
    %122 = vector.broadcast %120 : f32 to vector<1x16x16xf32>
    %123 = arith.mulf %122, %121 : vector<1x16x16xf32>
    %124 = arith.addf %119, %123 : vector<1x16x16xf32>
    %c20 = arith.constant 20 : index
    %125 = memref.load %arg1[%c20] : memref<45xf32, #tpu.memory_space<smem>>
    %126 = vector.extract_strided_slice %114 {offsets = [0, 0, 0], sizes = [1, 16, 16], strides = [1, 1, 1]} : vector<1x20x16xf32> to vector<1x16x16xf32>
    %127 = vector.broadcast %125 : f32 to vector<1x16x16xf32>
    %128 = arith.mulf %127, %126 : vector<1x16x16xf32>
    %129 = arith.addf %124, %128 : vector<1x16x16xf32>
    %c21 = arith.constant 21 : index
    %130 = memref.load %arg1[%c21] : memref<45xf32, #tpu.memory_space<smem>>
    %131 = vector.extract_strided_slice %115 {offsets = [0, 0, 0], sizes = [1, 16, 16], strides = [1, 1, 1]} : vector<1x20x16xf32> to vector<1x16x16xf32>
    %132 = vector.broadcast %130 : f32 to vector<1x16x16xf32>
    %133 = arith.mulf %132, %131 : vector<1x16x16xf32>
    %134 = arith.addf %129, %133 : vector<1x16x16xf32>
    %c22 = arith.constant 22 : index
    %135 = memref.load %arg1[%c22] : memref<45xf32, #tpu.memory_space<smem>>
    %136 = vector.extract_strided_slice %116 {offsets = [0, 0, 0], sizes = [1, 16, 16], strides = [1, 1, 1]} : vector<1x20x16xf32> to vector<1x16x16xf32>
    %137 = vector.broadcast %135 : f32 to vector<1x16x16xf32>
    %138 = arith.mulf %137, %136 : vector<1x16x16xf32>
    %139 = arith.addf %134, %138 : vector<1x16x16xf32>
    %c23 = arith.constant 23 : index
    %140 = memref.load %arg1[%c23] : memref<45xf32, #tpu.memory_space<smem>>
    %141 = vector.extract_strided_slice %117 {offsets = [0, 0, 0], sizes = [1, 16, 16], strides = [1, 1, 1]} : vector<1x20x16xf32> to vector<1x16x16xf32>
    %142 = vector.broadcast %140 : f32 to vector<1x16x16xf32>
    %143 = arith.mulf %142, %141 : vector<1x16x16xf32>
    %144 = arith.addf %139, %143 : vector<1x16x16xf32>
    %c24 = arith.constant 24 : index
    %145 = memref.load %arg1[%c24] : memref<45xf32, #tpu.memory_space<smem>>
    %146 = vector.extract_strided_slice %113 {offsets = [0, 1, 0], sizes = [1, 16, 16], strides = [1, 1, 1]} : vector<1x20x16xf32> to vector<1x16x16xf32>
    %147 = vector.broadcast %145 : f32 to vector<1x16x16xf32>
    %148 = arith.mulf %147, %146 : vector<1x16x16xf32>
    %149 = arith.addf %144, %148 : vector<1x16x16xf32>
    %c25 = arith.constant 25 : index
    %150 = memref.load %arg1[%c25] : memref<45xf32, #tpu.memory_space<smem>>
    %151 = vector.extract_strided_slice %114 {offsets = [0, 1, 0], sizes = [1, 16, 16], strides = [1, 1, 1]} : vector<1x20x16xf32> to vector<1x16x16xf32>
    %152 = vector.broadcast %150 : f32 to vector<1x16x16xf32>
    %153 = arith.mulf %152, %151 : vector<1x16x16xf32>
    %154 = arith.addf %149, %153 : vector<1x16x16xf32>
    %c26 = arith.constant 26 : index
    %155 = memref.load %arg1[%c26] : memref<45xf32, #tpu.memory_space<smem>>
    %156 = vector.extract_strided_slice %115 {offsets = [0, 1, 0], sizes = [1, 16, 16], strides = [1, 1, 1]} : vector<1x20x16xf32> to vector<1x16x16xf32>
    %157 = vector.broadcast %155 : f32 to vector<1x16x16xf32>
    %158 = arith.mulf %157, %156 : vector<1x16x16xf32>
    %159 = arith.addf %154, %158 : vector<1x16x16xf32>
    %c27 = arith.constant 27 : index
    %160 = memref.load %arg1[%c27] : memref<45xf32, #tpu.memory_space<smem>>
    %161 = vector.extract_strided_slice %116 {offsets = [0, 1, 0], sizes = [1, 16, 16], strides = [1, 1, 1]} : vector<1x20x16xf32> to vector<1x16x16xf32>
    %162 = vector.broadcast %160 : f32 to vector<1x16x16xf32>
    %163 = arith.mulf %162, %161 : vector<1x16x16xf32>
    %164 = arith.addf %159, %163 : vector<1x16x16xf32>
    %c28 = arith.constant 28 : index
    %165 = memref.load %arg1[%c28] : memref<45xf32, #tpu.memory_space<smem>>
    %166 = vector.extract_strided_slice %117 {offsets = [0, 1, 0], sizes = [1, 16, 16], strides = [1, 1, 1]} : vector<1x20x16xf32> to vector<1x16x16xf32>
    %167 = vector.broadcast %165 : f32 to vector<1x16x16xf32>
    %168 = arith.mulf %167, %166 : vector<1x16x16xf32>
    %169 = arith.addf %164, %168 : vector<1x16x16xf32>
    %c29 = arith.constant 29 : index
    %170 = memref.load %arg1[%c29] : memref<45xf32, #tpu.memory_space<smem>>
    %171 = vector.extract_strided_slice %113 {offsets = [0, 2, 0], sizes = [1, 16, 16], strides = [1, 1, 1]} : vector<1x20x16xf32> to vector<1x16x16xf32>
    %172 = vector.broadcast %170 : f32 to vector<1x16x16xf32>
    %173 = arith.mulf %172, %171 : vector<1x16x16xf32>
    %174 = arith.addf %169, %173 : vector<1x16x16xf32>
    %c30 = arith.constant 30 : index
    %175 = memref.load %arg1[%c30] : memref<45xf32, #tpu.memory_space<smem>>
    %176 = vector.extract_strided_slice %114 {offsets = [0, 2, 0], sizes = [1, 16, 16], strides = [1, 1, 1]} : vector<1x20x16xf32> to vector<1x16x16xf32>
    %177 = vector.broadcast %175 : f32 to vector<1x16x16xf32>
    %178 = arith.mulf %177, %176 : vector<1x16x16xf32>
    %179 = arith.addf %174, %178 : vector<1x16x16xf32>
    %c31 = arith.constant 31 : index
    %180 = memref.load %arg1[%c31] : memref<45xf32, #tpu.memory_space<smem>>
    %181 = vector.extract_strided_slice %115 {offsets = [0, 2, 0], sizes = [1, 16, 16], strides = [1, 1, 1]} : vector<1x20x16xf32> to vector<1x16x16xf32>
    %182 = vector.broadcast %180 : f32 to vector<1x16x16xf32>
    %183 = arith.mulf %182, %181 : vector<1x16x16xf32>
    %184 = arith.addf %179, %183 : vector<1x16x16xf32>
    %c32 = arith.constant 32 : index
    %185 = memref.load %arg1[%c32] : memref<45xf32, #tpu.memory_space<smem>>
    %186 = vector.extract_strided_slice %116 {offsets = [0, 2, 0], sizes = [1, 16, 16], strides = [1, 1, 1]} : vector<1x20x16xf32> to vector<1x16x16xf32>
    %187 = vector.broadcast %185 : f32 to vector<1x16x16xf32>
    %188 = arith.mulf %187, %186 : vector<1x16x16xf32>
    %189 = arith.addf %184, %188 : vector<1x16x16xf32>
    %c33 = arith.constant 33 : index
    %190 = memref.load %arg1[%c33] : memref<45xf32, #tpu.memory_space<smem>>
    %191 = vector.extract_strided_slice %117 {offsets = [0, 2, 0], sizes = [1, 16, 16], strides = [1, 1, 1]} : vector<1x20x16xf32> to vector<1x16x16xf32>
    %192 = vector.broadcast %190 : f32 to vector<1x16x16xf32>
    %193 = arith.mulf %192, %191 : vector<1x16x16xf32>
    %194 = arith.addf %189, %193 : vector<1x16x16xf32>
    %c34 = arith.constant 34 : index
    %195 = memref.load %arg1[%c34] : memref<45xf32, #tpu.memory_space<smem>>
    %196 = vector.extract_strided_slice %113 {offsets = [0, 3, 0], sizes = [1, 16, 16], strides = [1, 1, 1]} : vector<1x20x16xf32> to vector<1x16x16xf32>
    %197 = vector.broadcast %195 : f32 to vector<1x16x16xf32>
    %198 = arith.mulf %197, %196 : vector<1x16x16xf32>
    %199 = arith.addf %194, %198 : vector<1x16x16xf32>
    %c35 = arith.constant 35 : index
    %200 = memref.load %arg1[%c35] : memref<45xf32, #tpu.memory_space<smem>>
    %201 = vector.extract_strided_slice %114 {offsets = [0, 3, 0], sizes = [1, 16, 16], strides = [1, 1, 1]} : vector<1x20x16xf32> to vector<1x16x16xf32>
    %202 = vector.broadcast %200 : f32 to vector<1x16x16xf32>
    %203 = arith.mulf %202, %201 : vector<1x16x16xf32>
    %204 = arith.addf %199, %203 : vector<1x16x16xf32>
    %c36 = arith.constant 36 : index
    %205 = memref.load %arg1[%c36] : memref<45xf32, #tpu.memory_space<smem>>
    %206 = vector.extract_strided_slice %115 {offsets = [0, 3, 0], sizes = [1, 16, 16], strides = [1, 1, 1]} : vector<1x20x16xf32> to vector<1x16x16xf32>
    %207 = vector.broadcast %205 : f32 to vector<1x16x16xf32>
    %208 = arith.mulf %207, %206 : vector<1x16x16xf32>
    %209 = arith.addf %204, %208 : vector<1x16x16xf32>
    %c37 = arith.constant 37 : index
    %210 = memref.load %arg1[%c37] : memref<45xf32, #tpu.memory_space<smem>>
    %211 = vector.extract_strided_slice %116 {offsets = [0, 3, 0], sizes = [1, 16, 16], strides = [1, 1, 1]} : vector<1x20x16xf32> to vector<1x16x16xf32>
    %212 = vector.broadcast %210 : f32 to vector<1x16x16xf32>
    %213 = arith.mulf %212, %211 : vector<1x16x16xf32>
    %214 = arith.addf %209, %213 : vector<1x16x16xf32>
    %c38 = arith.constant 38 : index
    %215 = memref.load %arg1[%c38] : memref<45xf32, #tpu.memory_space<smem>>
    %216 = vector.extract_strided_slice %117 {offsets = [0, 3, 0], sizes = [1, 16, 16], strides = [1, 1, 1]} : vector<1x20x16xf32> to vector<1x16x16xf32>
    %217 = vector.broadcast %215 : f32 to vector<1x16x16xf32>
    %218 = arith.mulf %217, %216 : vector<1x16x16xf32>
    %219 = arith.addf %214, %218 : vector<1x16x16xf32>
    %c39 = arith.constant 39 : index
    %220 = memref.load %arg1[%c39] : memref<45xf32, #tpu.memory_space<smem>>
    %221 = vector.extract_strided_slice %113 {offsets = [0, 4, 0], sizes = [1, 16, 16], strides = [1, 1, 1]} : vector<1x20x16xf32> to vector<1x16x16xf32>
    %222 = vector.broadcast %220 : f32 to vector<1x16x16xf32>
    %223 = arith.mulf %222, %221 : vector<1x16x16xf32>
    %224 = arith.addf %219, %223 : vector<1x16x16xf32>
    %c40 = arith.constant 40 : index
    %225 = memref.load %arg1[%c40] : memref<45xf32, #tpu.memory_space<smem>>
    %226 = vector.extract_strided_slice %114 {offsets = [0, 4, 0], sizes = [1, 16, 16], strides = [1, 1, 1]} : vector<1x20x16xf32> to vector<1x16x16xf32>
    %227 = vector.broadcast %225 : f32 to vector<1x16x16xf32>
    %228 = arith.mulf %227, %226 : vector<1x16x16xf32>
    %229 = arith.addf %224, %228 : vector<1x16x16xf32>
    %c41 = arith.constant 41 : index
    %230 = memref.load %arg1[%c41] : memref<45xf32, #tpu.memory_space<smem>>
    %231 = vector.extract_strided_slice %115 {offsets = [0, 4, 0], sizes = [1, 16, 16], strides = [1, 1, 1]} : vector<1x20x16xf32> to vector<1x16x16xf32>
    %232 = vector.broadcast %230 : f32 to vector<1x16x16xf32>
    %233 = arith.mulf %232, %231 : vector<1x16x16xf32>
    %234 = arith.addf %229, %233 : vector<1x16x16xf32>
    %c42 = arith.constant 42 : index
    %235 = memref.load %arg1[%c42] : memref<45xf32, #tpu.memory_space<smem>>
    %236 = vector.extract_strided_slice %116 {offsets = [0, 4, 0], sizes = [1, 16, 16], strides = [1, 1, 1]} : vector<1x20x16xf32> to vector<1x16x16xf32>
    %237 = vector.broadcast %235 : f32 to vector<1x16x16xf32>
    %238 = arith.mulf %237, %236 : vector<1x16x16xf32>
    %239 = arith.addf %234, %238 : vector<1x16x16xf32>
    %c43 = arith.constant 43 : index
    %240 = memref.load %arg1[%c43] : memref<45xf32, #tpu.memory_space<smem>>
    %241 = vector.extract_strided_slice %117 {offsets = [0, 4, 0], sizes = [1, 16, 16], strides = [1, 1, 1]} : vector<1x20x16xf32> to vector<1x16x16xf32>
    %242 = vector.broadcast %240 : f32 to vector<1x16x16xf32>
    %243 = arith.mulf %242, %241 : vector<1x16x16xf32>
    %244 = arith.addf %239, %243 : vector<1x16x16xf32>
    %245 = arith.negf %244 : vector<1x16x16xf32>
    %246 = math.exp %245 : vector<1x16x16xf32>
    %cst_35 = arith.constant 1.000000e+00 : f32
    %247 = vector.broadcast %cst_35 : f32 to vector<1x16x16xf32>
    %248 = arith.addf %247, %246 : vector<1x16x16xf32>
    %249 = arith.divf %247, %248 : vector<1x16x16xf32>
    %c0_36 = arith.constant 0 : index
    %c0_37 = arith.constant 0 : index
    %c0_38 = arith.constant 0 : index
    %250 = vector.load %arg3[%c0_36, %c0_37, %c0_38] : memref<1x16x16xf32, #tpu.memory_space<vmem>>, vector<1x16x16xf32>
    tpu.vector_store %arg3[%c0_36, %c0_37, %c0_38], %249 {strides = array<i32>} : memref<1x16x16xf32, #tpu.memory_space<vmem>>, vector<1x16x16xf32>,
    return
  }
  func.func @transform_0(%arg0: i32) -> i32 {
    %c0_i32 = arith.constant 0 : i32
    %c0_i32_0 = arith.constant 0 : i32
    return %c0_i32 : i32
  }
  func.func @transform_1(%arg0: i32) -> (i32, i32, i32, i32) {
    %c0_i32 = arith.constant 0 : i32
    %c0_i32_0 = arith.constant 0 : i32
    %c0_i32_1 = arith.constant 0 : i32
    %c0_i32_2 = arith.constant 0 : i32
    return %arg0, %c0_i32, %c0_i32_0, %c0_i32_1 : i32, i32, i32, i32
  }
  func.func @transform_2(%arg0: i32) -> (i32, i32, i32) {
    %c0_i32 = arith.constant 0 : i32
    %c0_i32_0 = arith.constant 0 : i32
    %c0_i32_1 = arith.constant 0 : i32
    return %arg0, %c0_i32, %c0_i32_0 : i32, i32, i32
  }
}

</mosaic_0001>

<bundles_post_ra>
// kernel: squeeze.3
= control target key start
LH: loop header
LB: loop body
LE: loop exit
PB: predicated region body
PF: predicated region fallthrough
CT: control target
= control target key end

     0   :  { %s30_s8 = smov 3   ;;  %vm7_vm0 = vcmask 23552   ;;  %vm13_vm1 = vcmask 72752   ;;  %vm19_vm2 = vcmask 48152   ;;  %s47_s0 = inlined_call_operand.vmem [shape: f32[3,3], index: 0, kind: input, shape index: {}]   ;;  %s48_s1 = inlined_call_operand.vmem [shape: f32[9], index: 1, kind: output, shape index: {}]  }
   0x1   :  { %v4_v0 = vld [vmem:[%s47_s0] sm:$0xf]  ;;  %s29_s0 = smov 6  }
   0x2   :  { %5 = vst [vmem:[#allocation1] sm:$0xf] %v4_v0 }
   0x9   :  { %v10_v1 = vld [vmem:[#allocation1 + $0x2] sm:$0x1]   ;;  %v16_v2 = vld [vmem:[#allocation1 + $0x1] sm:$0x1]   ;;  %v6_v3 = vld [vmem:[#allocation1] sm:$0x1]  }
   0xa   :  { %11 = vrot.lane.b32.xlu0 %v10_v1, %s29_s0  ;;  %8 = vst.msk [vmem:[#allocation0] sm:$0x1] %vm7_vm0, %v6_v3  }
  0x12   :  { %17 = vrot.lane.b32.xlu0 %v16_v2, %s30_s8 }
  0x7c   :  { %v12_v4 = vpop.permute.xlu0 %11  }
  0x7d   :  { %14 = vst.msk [vmem:[#allocation0] sm:$0x1] %vm13_vm1, %v12_v4  }
  0x84   :  { %v18_v5 = vpop.permute.xlu0 %17  }
  0x85   :  { %20 = vst.msk [vmem:[#allocation0] sm:$0x1] %vm19_vm2, %v18_v5  }
  0x8c   :  { %v23_v6 = vld [vmem:[#allocation0] sm:$0x1] }
  0x8d   :  { %26 = vst [vmem:[%s48_s1] sm:$0x1] %v23_v6 }

// kernel: spatial_attention_forward.1
= control target key start
LH: loop header
LB: loop body
LE: loop exit
PB: predicated region body
PF: predicated region fallthrough
CT: control target
= control target key end

     0   :  { %s2184_s0 = inlined_call_operand.vmem [shape: f32[45], index: 0, kind: input, shape index: {}]   ;;  %s2185_s1 = inlined_call_operand.hbm [shape: f32[2,4,16,16], index: 1, kind: input, shape index: {}]   ;;  %s2186_s2 = inlined_call_operand.hbm [shape: f32[2,16,16], index: 2, kind: output, shape index: {}]  }
   0x1   :  { %2189 = sst [smem:[#allocation14_spill]] %s2184_s0 }
   0x2   :  { %7 = vsyncpa [#allocation8], 0 }
   0x3   :  { %8 = vsyncpa [#allocation6], 0 }
   0x4   :  { %10 = vsyncpa [#allocation6 + $0x1], 0 }
   0x5   :  { %11 = vsyncpa [#allocation7], 0 }
   0x6   :  { %13 = vsyncpa [#allocation7 + $0x1], 0  ;;  %s1472_s9 = smov 0   ;;  %s1474_s10 = smov 0  }
   0x7   :  { %s1476_s11 = smov 0   ;;  %s1478_s12 = smov 0  }
   0x8 LB: > { %s1493_s13 = sadd.s32 4294967295, %s1443_s12   ;;  %s1188_s14 = sadd.s32 4294967294, %s1443_s12   ;;  %s1443_s12 = sphi %s1478_s12, %s2202_s12   ;;  %s1439_s11 = sphi %s1476_s11, %s2201_s11   ;;  %s1435_s10 = sphi %s1474_s10, %s2200_s10   ;;  %s1431_s9 = sphi %s1472_s9, %s2199_s9  }
   0x9   : > { %s1497_s15 = sadd.s32 1, %s1443_s12   ;;  %s47_s16 = sadd.s32 1, %s1439_s11 }
   0xa   : > { %s44_s17 = ssub.s32 %s1443_s12, %s1497_s15  ;;  %p54_p0 = scmp.ne.s32.totalorder %s1439_s11, %s1435_s10 }
   0xb   : > { %p45_p1 = scmp.eq.s32.totalorder %s44_s17, 0  ;;  %p55_p2 = scmp.eq.s32.totalorder %s1443_s12, 0 }
   0xc   : > { %p60_p3 = scmp.ne.s32.totalorder %s1435_s10, %s1431_s9  ;;  %p61_p4 = scmp.eq.s32.totalorder %s1493_s13, 0 }
   0xd   : > { %s1509_s18 = scalar_select %p45_p1, %s1439_s11, %s47_s16  }
   0xe   : > { %p1511_p5 = por %p55_p2, %p54_p0  ;;  %p1517_p6 = por %p61_p4, %p60_p3 }
   0xf   : > { %p84_p7 = scmp.eq.s32.totalorder %s1493_s13, 1  ;;  %p90_p8 = scmp.eq.s32.totalorder %s1188_s14, 1 }
  0x10   : > { %p1189_p9 = scmp.ge.s32.totalorder %s1443_s12, 1  ;;  %p97_p10 = scmp.lt.s32.totalorder %s1443_s12, 3 }
  0x11   : > { %p1524_p11 = por %p84_p7, %p54_p0  ;;  %p1528_p12 = por %p90_p8, %p60_p3 }
  0x12   : > { %p1532_p13 = pnand %p1189_p9, %p97_p10  ;;  %s2195_s0 = sld [smem:[#allocation14_spill]] }
  0x13   : > { %p1273_p2 = scmp.lt.s32.totalorder %s1443_s12, 2  ;;  %s120_s27 = sand.u32 1, %s1439_s11  }
  0x14   : > { %p1260_p1 = pneg %p1532_p13  ;;  %s1192_s29 = sshll.u32 %s120_s27, 6 }
  0x15   : > { %p1548_p3 = pnand %p1273_p2, %p1511_p5  ;;  %s1445_s30 = smov [#allocation5]  }
  0x16   : > { %p1261_p7 = pnand %p1260_p1, %p61_p4  ;;  %s1250_s3 = sshll.u32 %s1443_s12, 6 }
  0x17   : > { %s124_s4 = scalar_lea.vmem [#allocation9], %s1192_s29  ;;  %s129_s8 = scalar_lea.hbm %s2185_s1, %s1250_s3 }
  0x18   : > { %s109_s26 = sshll.u32 %s2195_s0, 4  ;;  %s132_s5 = sshll.u32 %s124_s4, 4  ;;  %s110_s26 = int_to_ptr.vmem [resolvable:$true] %s109_s26  ;;  %s133_s5 = int_to_ptr.vmem [resolvable:$true] %s132_s5 }
  0x19   : > { %1263 = dma.vmem_to_smem (!%p1261_p7), %s110_s26, 16, %s1445_s30, [#allocation8]  }
  0x1a   : > { %s130_s14 = sshll.u32 %s129_s8, 4  ;;  %s121_s16 = scalar_lea.sflag [#allocation6], %s120_s27  ;;  %s131_s14 = int_to_ptr.hbm [resolvable:$true] %s130_s14 }
  0x1b   : > { %s1343_s17 = sshra.s32 %s131_s14, 4  ;;  %p1347_p8 = pneg %p1548_p3  ;;  %s1344_s17 = int_to_ptr.hbm [resolvable:$true] %s1343_s17 }
  0x1c   : > { %s1345_s19 = scalar_lea.hbm %s1344_s17, 64  ;;  %s1350_s26 = scalar_lea.hbm %s2185_s1, 128 }
  0x1d   : > { %p1346_p5 = scmp.ne.s32.totalorder %s1344_s17, %s1345_s19  ;;  %p1351_p1 = scmp.lt.s32.totalorder %s1344_s17, %s2185_s1 }
  0x1e   : > { %p1352_p2 = scmp.lt.s32.totalorder %s1350_s26, %s1345_s19 }
  0x1f   : > { %p1348_p9 = pnand %p1347_p8, %p1346_p5 }
  0x20   : > { %p1353_p7 = por %p1352_p2, %p1351_p1 }
  0x21   : > { %p1349_p10 = pneg %p1348_p9 }
  0x23   : > { %p1354_p0 = pnand %p1353_p7, %p1349_p10 }
  0x25   : > { %1357 = shalt.err (!%p1354_p0)
}
  0x26   : > { %s1446_s27 = smov 128   ;;  %s1447_s3 = smov 8  }
  0x27   : > { %1267 = dma.hbm_to_vmem [thread:$0]  (!%p1548_p3), %s131_s14, 1024, %s133_s5, %s121_s16, %s1446_s27, %s1446_s27, %s1447_s3  }
  0x28   : > { %144 = sbr.rel (%p1532_p13) target bundleno = 733 (0x2dd), region = 28 }
  0x2d   : > { %1418 = dma.done.wait (%p61_p4), [#allocation8], 16  }
  0x2e   : > { %1420 = vsyncadd (%p61_p4), [#allocation8], 4294967280  ;;  %s1573_s4 = sand.u32 1, %s1435_s10  }
  0x2f   : > { %s1197_s6 = sshll.u32 %s1573_s4, 6  ;;  %s152_s7 = scalar_lea.sflag [#allocation6], %s1573_s4 }
  0x30   : > { %s155_s8 = scalar_lea.vmem [#allocation9], %s1197_s6 }
  0x31   : > { %1422 = dma.done.wait (%p1517_p6), %s152_s7, 1024  }
  0x32   : > { %1424 = vsyncadd (%p1517_p6), %s152_s7, 4294966272 }
  0x33   : > { %161 = sfence }
  0x34   : > { %v178_v0 = vld [vmem:[%s155_s8] sm:$0xff]  ;;  %v180_v1 = vld [vmem:[%s155_s8 + $0x10] sm:$0xff]  ;;  %vm186_vm0 = vcmask 130048   ;;  %vm215_vm1 = vcmask 146432   ;;  %v179_v8 = vld [vmem:[%s155_s8 + $0x8] sm:$0xff]  ;;  %s1448_s20 = smov 1  }
  0x35   : > { %v182_v2 = vld [vmem:[%s155_s8 + $0x20] sm:$0xff]  ;;  %v184_v3 = vld [vmem:[%s155_s8 + $0x30] sm:$0xff]  ;;  %v201_v4 = vsel %vm186_vm0, %v178_v0, -inf  ;;  %v202_v5 = vsel %vm186_vm0, %v180_v1, -inf  ;;  %v187_v7 = vsel %vm186_vm0, %v178_v0, 0.0  ;;  %v188_v11 = vsel %vm186_vm0, %v180_v1, 0.0 }
  0x36   : > { %v203_v6 = vsel %vm186_vm0, %v182_v2, -inf  ;;  %v205_v10 = vsel %vm186_vm0, %v184_v3, -inf  ;;  %v190_v12 = vsel %vm186_vm0, %v182_v2, 0.0  ;;  %v181_v13 = vld [vmem:[%s155_s8 + $0x18] sm:$0xff]  ;;  %v183_v14 = vld [vmem:[%s155_s8 + $0x28] sm:$0xff]  ;;  %v189_v17 = vadd.f32 %v188_v11, %v187_v7  ;;  %s1202_s23 = sld [smem:[#allocation5 + $0xa]] }
  0x37   : > { %v204_v9 = vmax.f32 %v201_v4, %v203_v6  ;;  %v185_v15 = vld [vmem:[%s155_s8 + $0x38] sm:$0xff]  ;;  %v206_v16 = vmax.f32 %v202_v5, %v205_v10  ;;  %v192_v18 = vsel %vm186_vm0, %v184_v3, 0.0  ;;  %v208_v19 = vsel %vm186_vm0, %v179_v8, -inf  ;;  %s1609_s28 = sld [smem:[#allocation5 + $0xb]]  ;;  %s1450_s19 = smov 127  }
  0x38   : > { %v209_v20 = vsel %vm186_vm0, %v181_v13, -inf  ;;  %v210_v21 = vsel %vm186_vm0, %v183_v14, -inf  ;;  %v212_v22 = vsel %vm186_vm0, %v185_v15, -inf  ;;  %v194_v23 = vsel %vm186_vm0, %v179_v8, 0.0  ;;  %s1611_s5 = sld [smem:[#allocation5 + $0x2]]  ;;  %s2187_s6 = smov 126  }
  0x39   : > { %v207_v24 = vmax.f32 %v204_v9, %v206_v16  ;;  %v191_v25 = vadd.f32 %v190_v12, %v189_v17  ;;  %v211_v26 = vmax.f32 %v208_v19, %v210_v21  ;;  %v195_v27 = vsel %vm186_vm0, %v181_v13, 0.0  ;;  %s1615_s14 = sld [smem:[#allocation5 + $0x1]] }
  0x3a   : > { %v197_v28 = vsel %vm186_vm0, %v183_v14, 0.0  ;;  %v213_v30 = vmax.f32 %v209_v20, %v212_v22  ;;  %v196_v31 = vadd.f32 %v195_v27, %v194_v23  ;;  %v1449_v32 = vmov 0.0   ;;  %s1619_s16 = sld [smem:[#allocation5]] }
  0x3b   : > { %236 = vrot.lane.b32.xlu1 %v207_v24, %s1448_s20  ;;  %v193_v29 = vadd.f32 %v192_v18, %v191_v25  ;;  %220 = vst.msk [vmem:[#allocation3] sm:$0xff] %vm215_vm1, %v1449_v32  ;;  %v199_v34 = vsel %vm186_vm0, %v185_v15, 0.0  ;;  %vm218_vm2 = vcmask 140288   ;;  %vm231_vm3 = vcmask 138248   ;;  %s1208_s17 = sld [smem:[#allocation5 + $0xd]] }
  0x3c   : > { %221 = vst.msk [vmem:[#allocation3 + $0x8] sm:$0xff] %vm215_vm1, %v1449_v32  ;;  %v198_v33 = vadd.f32 %v197_v28, %v196_v31  ;;  %v214_v35 = vmax.f32 %v211_v26, %v213_v30  ;;  %v279_v39 = vstv %s1202_s23  ;;  %s1210_s24 = sld [smem:[#allocation5 + $0xe]]  ;;  %vm328_vm4 = vcmask 1046528  }
  0x3d   : > { %225 = vrot.lane.b32.xlu0 %v193_v29, %s1448_s20  ;;  %216 = vst.msk [vmem:[#allocation2] sm:$0xff] %vm215_vm1, %v1449_v32  ;;  %s1206_s25 = sld [smem:[#allocation5 + $0xc]]  ;;  %v307_v45 = vstv %s1609_s28  ;;  %vm447_vm5 = vcmask 1045504   ;;  %vm558_vm6 = vcmask 162816   ;;  %vm561_vm7 = vcmask 158720  }
  0x3e   : > { %217 = vst.msk [vmem:[#allocation2 + $0x8] sm:$0xff] %vm215_vm1, %v1449_v32  ;;  %v200_v36 = vadd.f32 %v199_v34, %v198_v33  ;;  %s1623_s26 = sld [smem:[#allocation5 + $0x12]]  ;;  %v293_v52 = vstv %s1611_s5  ;;  %vm571_vm8 = vcmask 146448   ;;  %vm851_vm9 = vcmask 1044480  }
  0x3f   : > { %222 = vst.msk [vmem:[#allocation3 + $0x10] sm:$0x3] %vm218_vm2, %v1449_v32  ;;  %s1205_s29 = sld [smem:[#allocation5 + $0x3]]  ;;  %v265_v61 = vstv %s1615_s14  ;;  %s1452_s14 = smov 2   ;;  %vm953_vm10 = vcmask 1043456  }
  0x40   : > { %219 = vst.msk [vmem:[#allocation2 + $0x10] sm:$0x3] %vm218_vm2, %v1449_v32  ;;  %s1625_s30 = sld [smem:[#allocation5 + $0x9]]  ;;  %v253_v50 = vstv %s1619_s16 }
  0x41   : > { %s1630_s27 = sld [smem:[#allocation5 + $0xf]]  ;;  %v1649_v54 = vstv %s1208_s17  ;;  %560 = vst.msk [vmem:[#allocation4 + $0x8] sm:$0xff] %vm558_vm6, %v1449_v32 }
  0x42   : > { %s1639_s3 = sld [smem:[#allocation5 + $0x6]]  ;;  %v419_v55 = vstv %s1210_s24  ;;  %562 = vst.msk [vmem:[#allocation4 + $0x10] sm:$0xf] %vm561_vm7, %v1449_v32 }
  0x43   : > { %238 = vrot.lane.b32.xlu1 %v214_v35, %s1448_s20  ;;  %s1207_s7 = sld [smem:[#allocation5 + $0x4]]  ;;  %v339_v59 = vstv %s1206_s25  ;;  %559 = vst.msk [vmem:[#allocation4] sm:$0xff] %vm558_vm6, %v1449_v32 }
  0x44   : > { %v251_v60 = vstv %s1623_s26  ;;  %s1209_s8 = sld [smem:[#allocation5 + $0x5]] }
  0x45   : > { %227 = vrot.lane.b32.xlu0 %v200_v36, %s1448_s20  ;;  %v321_v0 = vstv %s1205_s29  ;;  %s1213_s20 = sld [smem:[#allocation5 + $0x7]] }
  0x46   : > { %v259_v2 = vstv %s1625_s30  ;;  %s1214_s23 = sld [smem:[#allocation5 + $0x10]] }
  0x47   : > { %v458_v7 = vstv %s1630_s27  ;;  %s1215_s28 = sld [smem:[#allocation5 + $0x8]] }
  0x48   : > { %v440_v11 = vstv %s1639_s3  ;;  %s1216_s5 = sld [smem:[#allocation5 + $0x11]] }
  0x49   : > { %v356_v17 = vstv %s1207_s7  ;;  %s1224_s16 = sld [smem:[#allocation5 + $0x19]] }
  0x4a   : > { %s1225_s17 = sld [smem:[#allocation5 + $0x1a]] }
  0x4b   : > { %s1227_s24 = sld [smem:[#allocation5 + $0x1c]] }
  0x4c   : > { %s1219_s25 = sld [smem:[#allocation5 + $0x14]] }
  0x4d   : > { %s1795_s26 = sld [smem:[#allocation5 + $0x1b]] }
  0x4e   : > { %s1797_s29 = sld [smem:[#allocation5 + $0x1e]] }
  0x4f   : > { %s1799_s30 = sld [smem:[#allocation5 + $0x15]] }
  0x50   : > { %s1801_s27 = sld [smem:[#allocation5 + $0x16]] }
  0x51   : > { %s1803_s3 = sld [smem:[#allocation5 + $0x25]] }
  0x52   : > { %s1805_s7 = sld [smem:[#allocation5 + $0x28]] }
  0x53   : > { %s1825_s0 = sld [smem:[#allocation5 + $0x17]] }
  0xad   : > { %v237_v37 = vpop.permute.xlu1 %236 }
  0xae   : > { %242 = vst.msk [vmem:[#allocation3 + $0x1] sm:$0xff] %vm231_vm3, %v237_v37 }
  0xaf   : > { %v226_v38 = vpop.permute.xlu0 %225 }
  0xb0   : > { %232 = vst.msk [vmem:[#allocation2 + $0x1] sm:$0xff] %vm231_vm3, %v226_v38 }
  0xb5   : > { %v239_v40 = vpop.permute.xlu1 %238  ;;  %v1613_v41 = vld [vmem:[#allocation3] sm:$0xff] }
  0xb6   : > { %243 = vst.msk [vmem:[#allocation3 + $0x9] sm:$0xff] %vm231_vm3, %v239_v40  ;;  %v280_v42 = vmul.f32 %v279_v39, %v1613_v41  ;;  %v420_v1 = vmul.f32 %v419_v55, %v1613_v41  ;;  %v340_v3 = vmul.f32 %v339_v59, %v1613_v41  ;;  %v308_v8 = vmul.f32 %v307_v45, %v1613_v41 }
  0xb7   : > { %v228_v43 = vpop.permute.xlu0 %227  ;;  %v1634_v48 = vld [vmem:[#allocation2] sm:$0xff]  ;;  %v260_v14 = vmul.f32 %v259_v2, %v1613_v41  ;;  %v459_v22 = vmul.f32 %v458_v7, %v1613_v41 }
  0xb8   : > { %233 = vst.msk [vmem:[#allocation2 + $0x9] sm:$0xff] %vm231_vm3, %v228_v43  ;;  %284 = vrot.lane.b32.xlu0 %v280_v42, %s1450_s19  ;;  %v254_v58 = vmul.f32 %v253_v50, %v1634_v48  ;;  %v266_v9 = vmul.f32 %v265_v61, %v1634_v48  ;;  %v322_v10 = vmul.f32 %v321_v0, %v1634_v48  ;;  %v426_v15 = vrot.slane %v420_v1, 1 }
  0xb9   : > { %v346_v18 = vrot.slane %v340_v3, 1  ;;  %v441_v21 = vmul.f32 %v440_v11, %v1634_v48  ;;  %v357_v3 = vmul.f32 %v356_v17, %v1634_v48 }
  0xba   : > { %v256_v6 = vadd.f32 %v254_v58, %v251_v60  ;;  %v329_v26 = vrot.slane %v322_v10, 1 }
  0xbc   : > { %v1683_v20 = vadd.f32 %v260_v14, %v256_v6  ;;  %v475_v14 = vstv %s1213_s20  ;;  %s1242_s20 = sld [smem:[#allocation5 + $0x2b]] }
  0xbd   : > { %v1627_v44 = vld [vmem:[#allocation3 + $0x8] sm:$0xff]  ;;  %v1636_v49 = vld [vmem:[#allocation3 + $0x10] sm:$0x3] }
  0xbe   : > { %v309_v46 = vmul.f32 %v307_v45, %v1627_v44  ;;  %v281_v47 = vmul.f32 %v279_v39, %v1627_v44  ;;  %v1653_v56 = vmul.f32 %v1649_v54, %v1627_v44  ;;  %v380_v57 = vmul.f32 %v1649_v54, %v1636_v49 }
  0xbf   : > { %v1641_v51 = vld [vmem:[#allocation2 + $0x8] sm:$0xff]  ;;  %v1662_v62 = vmul.f32 %v419_v55, %v1627_v44  ;;  %v422_v63 = vmul.f32 %v419_v55, %v1636_v49  ;;  %v1678_v16 = vld [vmem:[#allocation2 + $0x10] sm:$0x3]  ;;  %v261_v31 = vmul.f32 %v259_v2, %v1627_v44  ;;  %v341_v34 = vmul.f32 %v339_v59, %v1627_v44 }
  0xc0   : > { %314 = vrot.lane.b32.xlu2 %v309_v46, %s2187_s6  ;;  %286 = vrot.lane.b32.xlu1 %v281_v47, %s1450_s19  ;;  %v295_v53 = vmul.f32 %v293_v52, %v1641_v51  ;;  %v385_v4 = vrot.slane %v1653_v56, 1  ;;  %v387_v5 = vrot.slane %v380_v57, 1  ;;  %v267_v23 = vmul.f32 %v265_v61, %v1641_v51 }
  0xc1   : > { %v427_v12 = vrot.slane %v1662_v62, 1  ;;  %v429_v13 = vrot.slane %v422_v63, 1  ;;  %v358_v24 = vmul.f32 %v356_v17, %v1641_v51  ;;  %v255_v25 = vmul.f32 %v253_v50, %v1641_v51 }
  0xc2   : > { %300 = vrot.lane.b32.xlu0 %v295_v53, %s2187_s6  ;;  %v388_v19 = vsel %vm328_vm4, %v385_v4, %v387_v5  ;;  %v359_v28 = vmul.f32 %v356_v17, %v1678_v16  ;;  %v323_v29 = vmul.f32 %v321_v0, %v1641_v51  ;;  %v324_v30 = vmul.f32 %v321_v0, %v1678_v16 }
  0xc3   : > { %v430_v27 = vsel %vm328_vm4, %v427_v12, %v429_v13  ;;  %v257_v33 = vadd.f32 %v255_v25, %v251_v60  ;;  %v342_v35 = vmul.f32 %v339_v59, %v1636_v49  ;;  %v442_v38 = vmul.f32 %v440_v11, %v1641_v51 }
  0xc4   : > { %v330_v36 = vrot.slane %v323_v29, 1  ;;  %v332_v37 = vrot.slane %v324_v30, 1  ;;  %v448_v39 = vrot.slane %v441_v21, 2  ;;  %v347_v42 = vrot.slane %v341_v34, 1 }
  0xc5   : > { %v1699_v40 = vadd.f32 %v261_v31, %v257_v33  ;;  %v349_v43 = vrot.slane %v342_v35, 1  ;;  %v460_v45 = vmul.f32 %v458_v7, %v1627_v44  ;;  %v449_v50 = vrot.slane %v442_v38, 2 }
  0xc6   : > { %v1703_v46 = vsel %vm328_vm4, %v329_v26, %v330_v36  ;;  %v1706_v47 = vsel %vm328_vm4, %v330_v36, %v332_v37  ;;  %v465_v53 = vrot.slane %v459_v22, 2  ;;  %v1714_v57 = vsel %vm328_vm4, %v346_v18, %v347_v42 }
  0xc7   : > { %v1711_v55 = vsel %vm328_vm4, %v347_v42, %v349_v43  ;;  %v466_v58 = vrot.slane %v460_v45, 2  ;;  %v443_v59 = vmul.f32 %v440_v11, %v1678_v16  ;;  %v428_v60 = vsel %vm328_vm4, %v426_v15, %v427_v12 }
  0xc8   : > { %312 = vrot.lane.b32.xlu1 %v308_v8, %s2187_s6  ;;  %270 = vrot.lane.b32.xlu2 %v266_v9, %s1450_s19  ;;  %v1719_v61 = vsel %vm447_vm5, %v448_v39, %v449_v50  ;;  %v461_v62 = vmul.f32 %v458_v7, %v1636_v49  ;;  %v364_v1 = vrot.slane %v358_v24, 1  ;;  %v366_v2 = vrot.slane %v359_v28, 1 }
  0xc9   : > { %v1724_v63 = vsel %vm447_vm5, %v465_v53, %v466_v58  ;;  %v451_v0 = vrot.slane %v443_v59, 2  ;;  %v294_v7 = vmul.f32 %v293_v52, %v1634_v48  ;;  %v398_v9 = vstv %s1209_s8  ;;  %s1240_s8 = sld [smem:[#allocation5 + $0x29]] }
  0xca   : > { %391 = vrot.lane.b32.xlu0 %v388_v19, %s1450_s19  ;;  %v468_v5 = vrot.slane %v461_v62, 2  ;;  %v367_v10 = vsel %vm328_vm4, %v364_v1, %v366_v2  ;;  %v363_v11 = vrot.slane %v357_v3, 1  ;;  %v400_v12 = vmul.f32 %v398_v9, %v1641_v51 }
  0xcb   : > { %v1728_v6 = vsel %vm447_vm5, %v449_v50, %v451_v0  ;;  %v378_v13 = vmul.f32 %v1649_v54, %v1613_v41  ;;  %v399_v17 = vmul.f32 %v398_v9, %v1634_v48  ;;  %v477_v52 = vmul.f32 %v475_v14, %v1641_v51 }
  0xcc   : > { %v1731_v8 = vsel %vm447_vm5, %v466_v58, %v468_v5  ;;  %v365_v15 = vsel %vm328_vm4, %v363_v11, %v364_v1  ;;  %v478_v18 = vmul.f32 %v475_v14, %v1678_v16  ;;  %v406_v19 = vrot.slane %v400_v12, 1 }
  0xcd   : > { %v405_v21 = vrot.slane %v399_v17, 1  ;;  %v384_v22 = vrot.slane %v378_v13, 1  ;;  %v496_v25 = vstv %s1214_s23  ;;  %v517_v26 = vstv %s1215_s28  ;;  %s1241_s23 = sld [smem:[#allocation5 + $0x2a]] }
  0xce   : > { %v485_v24 = vrot.slane %v478_v18, 2  ;;  %v498_v28 = vmul.f32 %v496_v25, %v1627_v44  ;;  %v499_v29 = vmul.f32 %v496_v25, %v1636_v49  ;;  %v497_v31 = vmul.f32 %v496_v25, %v1613_v41  ;;  %s1223_s28 = sld [smem:[#allocation5 + $0x18]] }
  0xcf   : > { %v407_v54 = vsel %vm328_vm4, %v405_v21, %v406_v19  ;;  %v519_v33 = vmul.f32 %v517_v26, %v1641_v51  ;;  %v518_v56 = vmul.f32 %v517_v26, %v1634_v48  ;;  %v520_v42 = vmul.f32 %v517_v26, %v1678_v16 }
  0xd0   : > { %433 = vrot.lane.b32.xlu1 %v430_v27, %s2187_s6  ;;  %272 = vrot.lane.b32.xlu2 %v267_v23, %s1450_s19  ;;  %v483_v23 = vrot.slane %v477_v52, 2  ;;  %v386_v27 = vsel %vm328_vm4, %v384_v22, %v385_v4  ;;  %v504_v4 = vrot.slane %v498_v28, 2  ;;  %v506_v34 = vrot.slane %v499_v29, 2 }
  0xd1   : > { %v503_v35 = vrot.slane %v497_v31, 2  ;;  %v525_v36 = vrot.slane %v519_v33, 2  ;;  %v524_v37 = vrot.slane %v518_v56, 2  ;;  %v401_v43 = vmul.f32 %v398_v9, %v1678_v16 }
  0xd2   : > { %431 = vrot.lane.b32.xlu0 %v428_v60, %s2187_s6  ;;  %v486_v30 = vsel %vm447_vm5, %v483_v23, %v485_v24  ;;  %v507_v39 = vsel %vm447_vm5, %v504_v4, %v506_v34  ;;  %v538_v51 = vstv %s1216_s5  ;;  %v527_v58 = vrot.slane %v520_v42, 2  ;;  %s1228_s5 = sld [smem:[#allocation5 + $0x1d]] }
  0xd3   : > { %v505_v38 = vsel %vm447_vm5, %v503_v35, %v504_v4  ;;  %v526_v45 = vsel %vm447_vm5, %v524_v37, %v525_v36  ;;  %v540_v50 = vmul.f32 %v538_v51, %v1627_v44  ;;  %v541_v53 = vmul.f32 %v538_v51, %v1636_v49 }
  0xd4   : > { %v408_v59 = vrot.slane %v401_v43, 1  ;;  %v528_v0 = vsel %vm447_vm5, %v525_v36, %v527_v58  ;;  %v476_v44 = vmul.f32 %v475_v14, %v1634_v48  ;;  %v539_v3 = vmul.f32 %v538_v51, %v1613_v41 }
  0xd5   : > { %v546_v60 = vrot.slane %v540_v50, 2  ;;  %v548_v62 = vrot.slane %v541_v53, 2 }
  0xd6   : > { %v409_v16 = vsel %vm328_vm4, %v406_v19, %v408_v59  ;;  %v482_v49 = vrot.slane %v476_v44, 2  ;;  %v545_v5 = vrot.slane %v539_v3, 2  ;;  %v586_v44 = vstv %s1219_s25  ;;  %s2197_s25 = smov 126  }
  0xd7   : > { %v549_v1 = vsel %vm447_vm5, %v546_v60, %v548_v62 }
  0xd8   : > { %370 = vrot.lane.b32.xlu1 %v367_v10, %s1450_s19  ;;  %298 = vrot.lane.b32.xlu2 %v294_v7, %s2187_s6  ;;  %v484_v2 = vsel %vm447_vm5, %v482_v49, %v483_v23  ;;  %v547_v7 = vsel %vm447_vm5, %v545_v5, %v546_v60  ;;  %v600_v49 = vstv %s1799_s30  ;;  %s1820_s30 = sld [smem:[#allocation5 + $0x26]] }
  0xda   : > { %368 = vrot.lane.b32.xlu0 %v365_v15, %s1450_s19 }
  0xe0   : > { %410 = vrot.lane.b32.xlu1 %v407_v54, %s2187_s6  ;;  %389 = vrot.lane.b32.xlu2 %v386_v27, %s1450_s19 }
  0xe2   : > { %489 = vrot.lane.b32.xlu0 %v486_v30, %s1450_s19 }
  0xe8   : > { %508 = vrot.lane.b32.xlu1 %v505_v38, %s1450_s19  ;;  %510 = vrot.lane.b32.xlu2 %v507_v39, %s1450_s19 }
  0xea   : > { %529 = vrot.lane.b32.xlu0 %v526_v45, %s2187_s6 }
  0xf0   : > { %531 = vrot.lane.b32.xlu1 %v528_v0, %s2187_s6  ;;  %412 = vrot.lane.b32.xlu2 %v409_v16, %s2187_s6 }
  0xf2   : > { %552 = vrot.lane.b32.xlu0 %v549_v1, %s2187_s6 }
  0xf8   : > { %487 = vrot.lane.b32.xlu2 %v484_v2, %s1450_s19 }
 0x100   : > { %550 = vrot.lane.b32.xlu2 %v547_v7, %s2187_s6  ;;  %s1238_s6 = sld [smem:[#allocation5 + $0x27]] }
 0x11a   : > { %v315_v9 = vpop.permute.xlu2 %314 }
 0x122   : > { %v271_v10 = vpop.permute.xlu2 %270 }
 0x123   : > { %v276_v52 = vadd.f32 %v271_v10, %v1683_v20  ;;  %v659_v10 = vstv %s1224_s16  ;;  %s1231_s16 = sld [smem:[#allocation5 + $0x20]] }
 0x12a   : > { %v273_v11 = vpop.permute.xlu2 %272  ;;  %v285_v12 = vpop.permute.xlu0 %284 }
 0x12b   : > { %v277_v48 = vadd.f32 %v273_v11, %v1699_v40  ;;  %v290_v19 = vadd.f32 %v285_v12, %v276_v52  ;;  %v680_v11 = vstv %s1225_s17  ;;  %v614_v12 = vstv %s1801_s27  ;;  %s1230_s17 = sld [smem:[#allocation5 + $0x1f]] }
 0x12c   : > { %v964_v52 = vstv %s1805_s7  ;;  %s1218_s27 = sld [smem:[#allocation5 + $0x13]]  ;;  %s1251_s7 = sshll.u32 %s1493_s13, 4 }
 0x132   : > { %v287_v13 = vpop.permute.xlu1 %286  ;;  %v299_v14 = vpop.permute.xlu2 %298 }
 0x133   : > { %v291_v15 = vadd.f32 %v287_v13, %v277_v48  ;;  %v304_v21 = vadd.f32 %v299_v14, %v290_v19  ;;  %v1818_v48 = vstv %s1227_s24  ;;  %v701_v14 = vstv %s1795_s26  ;;  %s1232_s24 = sld [smem:[#allocation5 + $0x21]] }
 0x134   : > { %v301_v17 = vpop.permute.xlu0 %300  ;;  %v1836_v19 = vstv %s1241_s23  ;;  %s1235_s26 = sld [smem:[#allocation5 + $0x24]]  ;;  %s1099_s23 = scalar_lea.hbm %s2186_s2, %s1251_s7 }
 0x135   : > { %v305_v18 = vadd.f32 %v301_v17, %v291_v15  ;;  %v1829_v15 = vstv %s1797_s29  ;;  %v1831_v17 = vstv %s1240_s8  ;;  %s1234_s29 = sld [smem:[#allocation5 + $0x23]] }
 0x137   : > { %v319_v41 = vadd.f32 %v315_v9, %v305_v18  ;;  %v1834_v18 = vstv %s1242_s20 }
 0x139   : > { %v337_v22 = vadd.f32 %v1706_v47, %v319_v41  ;;  %v1838_v41 = vstv %s1223_s28 }
 0x13a   : > { %v313_v23 = vpop.permute.xlu1 %312  ;;  %v390_v24 = vpop.permute.xlu2 %389 }
 0x13b   : > { %v318_v25 = vadd.f32 %v313_v23, %v304_v21  ;;  %v354_v26 = vadd.f32 %v1711_v55, %v337_v22  ;;  %v1841_v21 = vstv %s1803_s3  ;;  %v1843_v22 = vstv %s1228_s5  ;;  %s1217_s3 = sld [smem:[#allocation5 + $0x2c]]  ;;  %s1102_s5 = sshll.u32 %s1099_s23, 4  ;;  %s1103_s5 = int_to_ptr.hbm [resolvable:$true] %s1102_s5 }
 0x13c   : > { %v392_v54 = vpop.permute.xlu0 %391 }
 0x13d   : > { %v336_v40 = vadd.f32 %v1703_v46, %v318_v25 }
 0x13f   : > { %v353_v27 = vadd.f32 %v1714_v57, %v336_v40 }
 0x142   : > { %v434_v28 = vpop.permute.xlu1 %433  ;;  %v511_v29 = vpop.permute.xlu2 %510 }
 0x144   : > { %v432_v30 = vpop.permute.xlu0 %431 }
 0x14a   : > { %v371_v20 = vpop.permute.xlu1 %370  ;;  %v413_v31 = vpop.permute.xlu2 %412 }
 0x14b   : > { %v375_v47 = vadd.f32 %v371_v20, %v354_v26 }
 0x14c   : > { %v369_v55 = vpop.permute.xlu0 %368 }
 0x14d   : > { %v396_v33 = vadd.f32 %v392_v54, %v375_v47  ;;  %v374_v56 = vadd.f32 %v369_v55, %v353_v27 }
 0x14f   : > { %v417_v46 = vadd.f32 %v413_v31, %v396_v33  ;;  %v395_v57 = vadd.f32 %v390_v24, %v374_v56  ;;  %v1847_v24 = vstv %s1238_s6  ;;  %s1453_s6 = smov 125  }
 0x151   : > { %v438_v4 = vadd.f32 %v434_v28, %v417_v46 }
 0x152   : > { %v411_v34 = vpop.permute.xlu1 %410  ;;  %v488_v42 = vpop.permute.xlu2 %487 }
 0x153   : > { %v416_v35 = vadd.f32 %v411_v34, %v395_v57  ;;  %v456_v36 = vadd.f32 %v1728_v6, %v438_v4 }
 0x154   : > { %v490_v37 = vpop.permute.xlu0 %489 }
 0x155   : > { %v437_v38 = vadd.f32 %v432_v30, %v416_v35  ;;  %v473_v39 = vadd.f32 %v1731_v8, %v456_v36  ;;  %v1897_v36 = vstv %s1820_s30 }
 0x157   : > { %v455_v43 = vadd.f32 %v1719_v61, %v437_v38  ;;  %v494_v53 = vadd.f32 %v490_v37, %v473_v39  ;;  %v628_v37 = vstv %s1825_s0  ;;  %s1454_s0 = smov 124  }
 0x159   : > { %v472_v32 = vadd.f32 %v1724_v63, %v455_v43  ;;  %v515_v0 = vadd.f32 %v511_v29, %v494_v53 }
 0x15a   : > { %v509_v51 = vpop.permute.xlu1 %508  ;;  %v551_v60 = vpop.permute.xlu2 %550 }
 0x15b   : > { %v493_v45 = vadd.f32 %v488_v42, %v472_v32 }
 0x15c   : > { %v530_v50 = vpop.permute.xlu0 %529 }
 0x15d   : > { %v514_v58 = vadd.f32 %v509_v51, %v493_v45 }
 0x15f   : > { %v535_v59 = vadd.f32 %v530_v50, %v514_v58 }
 0x161   : > { %v556_v62 = vadd.f32 %v551_v60, %v535_v59 }
 0x162   : > { %v532_v16 = vpop.permute.xlu1 %531 }
 0x163   : > { %v536_v6 = vadd.f32 %v532_v16, %v515_v0  ;;  %565 = vrot.lane.b32.xlu1 %v556_v62, %s1452_s14 }
 0x164   : > { %v553_v1 = vpop.permute.xlu0 %552 }
 0x165   : > { %v557_v8 = vadd.f32 %v553_v1, %v536_v6 }
 0x167   : > { %567 = vrot.lane.b32.xlu2 %v557_v8, %s1452_s14  ;;  %s1233_s14 = sld [smem:[#allocation5 + $0x22]] }
 0x16d   : > { %v1845_v23 = vstv %s1233_s14  ;;  %s1088_s14 = scalar_lea.sflag [#allocation7], %s1573_s4 }
 0x1c1   : > { %v568_v61 = vpop.permute.xlu2 %567 }
 0x1c2   : > { %573 = vst.msk [vmem:[#allocation4 + $0xa] sm:$0xff] %vm571_vm8, %v568_v61 }
 0x1c9   : > { %v1822_v13 = vld [vmem:[#allocation4 + $0x10] sm:$0xf] }
 0x1ca   : > { %v1850_v25 = vmul.f32 %v680_v11, %v1822_v13  ;;  %v662_v26 = vmul.f32 %v659_v10, %v1822_v13  ;;  %v1854_v54 = vmul.f32 %v701_v14, %v1822_v13  ;;  %v1858_v40 = vmul.f32 %v1831_v17, %v1822_v13 }
 0x1cb   : > { %v1861_v27 = vmul.f32 %v964_v52, %v1822_v13  ;;  %v1865_v28 = vmul.f32 %v1836_v19, %v1822_v13  ;;  %v1869_v29 = vmul.f32 %v1834_v18, %v1822_v13  ;;  %v1873_v30 = vmul.f32 %v1838_v41, %v1822_v13 }
 0x1cc   : > { %v1879_v31 = vmul.f32 %v1843_v22, %v1822_v13  ;;  %v1883_v55 = vmul.f32 %v1845_v23, %v1822_v13  ;;  %v1890_v4 = vmul.f32 %v1847_v24, %v1822_v13  ;;  %v690_v57 = vrot.slane %v1850_v25, 1 }
 0x1cd   : > { %v669_v34 = vrot.slane %v662_v26, 1  ;;  %v711_v35 = vrot.slane %v1854_v54, 1  ;;  %v995_v39 = vrot.slane %v1858_v40, 4  ;;  %v974_v42 = vrot.slane %v1861_v27, 4 }
 0x1ce   : > { %v1016_v43 = vrot.slane %v1865_v28, 4  ;;  %v1037_v32 = vrot.slane %v1869_v29, 4  ;;  %v652_v51 = vrot.slane %v1873_v30, 1  ;;  %v753_v45 = vrot.slane %v1879_v31, 2 }
 0x1cf   : > { %v855_v58 = vrot.slane %v1883_v55, 3  ;;  %v957_v59 = vrot.slane %v1890_v4, 4  ;;  %v725_v55 = vmul.f32 %v1818_v48, %v1822_v13  ;;  %v763_v4 = vmul.f32 %v1829_v15, %v1822_v13 }
 0x1d5   : > { %v566_v63 = vpop.permute.xlu1 %565 }
 0x1d6   : > { %572 = vst.msk [vmem:[#allocation4 + $0x2] sm:$0xff] %vm571_vm8, %v566_v63 }
 0x1dd   : > { %v1808_v2 = vld [vmem:[#allocation4] sm:$0xff]  ;;  %v1810_v3 = vld [vmem:[#allocation4 + $0x8] sm:$0xff] }
 0x1de   : > { %v587_v5 = vmul.f32 %v586_v44, %v1808_v2  ;;  %v601_v7 = vmul.f32 %v600_v49, %v1808_v2  ;;  %v588_v9 = vmul.f32 %v586_v44, %v1810_v3  ;;  %v616_v20 = vmul.f32 %v614_v12, %v1810_v3 }
 0x1df   : > { %v602_v47 = vmul.f32 %v600_v49, %v1810_v3  ;;  %v615_v33 = vmul.f32 %v614_v12, %v1808_v2  ;;  %v660_v56 = vmul.f32 %v659_v10, %v1808_v2  ;;  %v661_v46 = vmul.f32 %v659_v10, %v1810_v3 }
 0x1e0   : > { %591 = vrot.lane.b32.xlu0 %v587_v5, %s1450_s19  ;;  %605 = vrot.lane.b32.xlu2 %v601_v7, %s2197_s25  ;;  %v682_v38 = vmul.f32 %v680_v11, %v1810_v3  ;;  %v629_v60 = vmul.f32 %v628_v37, %v1808_v2  ;;  %v630_v62 = vmul.f32 %v628_v37, %v1810_v3 }
 0x1e1   : > { %593 = vrot.lane.b32.xlu1 %v588_v9, %s1450_s19  ;;  %v666_v50 = vrot.slane %v660_v56, 1  ;;  %v667_v53 = vrot.slane %v661_v46, 1  ;;  %v681_v16 = vmul.f32 %v680_v11, %v1808_v2  ;;  %v723_v6 = vmul.f32 %v1818_v48, %v1808_v2 }
 0x1e2   : > { %v688_v0 = vrot.slane %v682_v38, 1  ;;  %v1917_v1 = vmul.f32 %v1818_v48, %v1810_v3  ;;  %v1921_v8 = vmul.f32 %v1841_v21, %v1810_v3  ;;  %v905_v61 = vmul.f32 %v1841_v21, %v1808_v2 }
 0x1e3   : > { %v965_v63 = vmul.f32 %v964_v52, %v1808_v2  ;;  %v966_v44 = vmul.f32 %v964_v52, %v1810_v3  ;;  %v668_v49 = vsel %vm328_vm4, %v666_v50, %v667_v53  ;;  %v670_v5 = vsel %vm328_vm4, %v667_v53, %v669_v34 }
 0x1e4   : > { %v702_v7 = vmul.f32 %v701_v14, %v1808_v2  ;;  %v1931_v9 = vmul.f32 %v701_v14, %v1810_v3  ;;  %v912_v10 = vrot.slane %v1921_v8, 3  ;;  %v911_v11 = vrot.slane %v905_v61, 3 }
 0x1e5   : > { %v971_v12 = vrot.slane %v965_v63, 4  ;;  %v972_v25 = vrot.slane %v966_v44, 4  ;;  %v687_v52 = vrot.slane %v681_v16, 1  ;;  %v729_v26 = vrot.slane %v723_v6, 1 }
 0x1e6   : > { %v926_v40 = vmul.f32 %v1897_v36, %v1808_v2  ;;  %v1941_v14 = vmul.f32 %v1897_v36, %v1810_v3  ;;  %v691_v27 = vsel %vm328_vm4, %v688_v0, %v690_v57  ;;  %v986_v57 = vmul.f32 %v1831_v17, %v1808_v2 }
 0x1e7   : > { %v1956_v34 = vsel %vm953_vm10, %v972_v25, %v974_v42  ;;  %v1028_v38 = vmul.f32 %v1834_v18, %v1808_v2  ;;  %v1029_v50 = vmul.f32 %v1834_v18, %v1810_v3  ;;  %v1007_v53 = vmul.f32 %v1836_v19, %v1808_v2 }
 0x1e8   : > { %621 = vrot.lane.b32.xlu2 %v616_v20, %s1453_s6  ;;  %607 = vrot.lane.b32.xlu0 %v602_v47, %s2197_s25  ;;  %v1947_v20 = vsel %vm851_vm9, %v911_v11, %v912_v10  ;;  %v1950_v47 = vsel %vm953_vm10, %v971_v12, %v972_v25  ;;  %v932_v56 = vrot.slane %v926_v40, 3  ;;  %v933_v46 = vrot.slane %v1941_v14, 3 }
 0x1e9   : > { %619 = vrot.lane.b32.xlu1 %v615_v33, %s1453_s6  ;;  %v987_v33 = vmul.f32 %v1831_v17, %v1810_v3  ;;  %v1008_v17 = vmul.f32 %v1836_v19, %v1810_v3  ;;  %v1034_v6 = vrot.slane %v1028_v38, 4  ;;  %v1035_v61 = vrot.slane %v1029_v50, 4 }
 0x1ea   : > { %v1970_v42 = vsel %vm851_vm9, %v932_v56, %v933_v46  ;;  %v1013_v18 = vrot.slane %v1007_v53, 4  ;;  %v689_v63 = vsel %vm328_vm4, %v687_v52, %v688_v0  ;;  %v708_v44 = vrot.slane %v702_v7, 1 }
 0x1eb   : > { %v993_v37 = vrot.slane %v987_v33, 4  ;;  %v709_v11 = vrot.slane %v1931_v9, 1  ;;  %v1985_v19 = vsel %vm953_vm10, %v1034_v6, %v1035_v61  ;;  %v643_v0 = vmul.f32 %v1838_v41, %v1808_v2 }
 0x1ec   : > { %v744_v25 = vmul.f32 %v1843_v22, %v1808_v2  ;;  %v745_v52 = vmul.f32 %v1843_v22, %v1810_v3  ;;  %v845_v40 = vmul.f32 %v1845_v23, %v1808_v2  ;;  %v947_v28 = vmul.f32 %v1847_v24, %v1808_v2 }
 0x1ed   : > { %v1975_v16 = vsel %vm953_vm10, %v993_v37, %v995_v39  ;;  %v1990_v39 = vsel %vm953_vm10, %v1035_v61, %v1037_v32  ;;  %v644_v32 = vmul.f32 %v1838_v41, %v1810_v3  ;;  %v649_v12 = vrot.slane %v643_v0, 1 }
 0x1ee   : > { %v710_v41 = vsel %vm328_vm4, %v708_v44, %v709_v11  ;;  %v750_v33 = vrot.slane %v744_v25, 2  ;;  %v751_v56 = vrot.slane %v745_v52, 2  ;;  %v852_v22 = vrot.slane %v845_v40, 3 }
 0x1ef   : > { %v712_v31 = vsel %vm328_vm4, %v709_v11, %v711_v35  ;;  %v770_v61 = vrot.slane %v763_v4, 2  ;;  %v823_v25 = vstv %s1232_s24  ;;  %v580_v14 = vstv %s1218_s27 }
 0x1f0   : > { %671 = vrot.lane.b32.xlu2 %v668_v49, %s1450_s19  ;;  %633 = vrot.lane.b32.xlu0 %v629_v60, %s1454_s0  ;;  %v730_v60 = vrot.slane %v1917_v1, 1  ;;  %v1014_v49 = vrot.slane %v1008_v17, 4  ;;  %v2035_v53 = vsel %vm447_vm5, %v751_v56, %v753_v45  ;;  %v761_v45 = vmul.f32 %v1829_v15, %v1808_v2 }
 0x1f1   : > { %635 = vrot.lane.b32.xlu1 %v630_v62, %s1454_s0  ;;  %v992_v62 = vrot.slane %v986_v57, 4  ;;  %v825_v40 = vmul.f32 %v823_v25, %v1810_v3 }
 0x1f2   : > { %v731_v7 = vsel %vm328_vm4, %v729_v26, %v730_v60  ;;  %v1999_v9 = vsel %vm953_vm10, %v1013_v18, %v1014_v49  ;;  %v2004_v29 = vsel %vm953_vm10, %v1014_v49, %v1016_v43  ;;  %v846_v26 = vmul.f32 %v1845_v23, %v1810_v3 }
 0x1f3   : > { %v1979_v1 = vsel %vm953_vm10, %v992_v62, %v993_v37  ;;  %v948_v43 = vmul.f32 %v1847_v24, %v1810_v3  ;;  %v954_v37 = vrot.slane %v947_v28, 4  ;;  %v2030_v24 = vsel %vm447_vm5, %v750_v33, %v751_v56 }
 0x1f4   : > { %v853_v57 = vrot.slane %v846_v26, 3  ;;  %v767_v6 = vrot.slane %v761_v45, 2  ;;  %v802_v18 = vstv %s1231_s16  ;;  %v831_v33 = vrot.slane %v825_v40, 2  ;;  %s1393_s16 = scalar_lea.hbm %s2186_s2, 32 }
 0x1f5   : > { %v955_v38 = vrot.slane %v948_v43, 4  ;;  %v803_v35 = vmul.f32 %v802_v18, %v1808_v2  ;;  %v804_v44 = vmul.f32 %v802_v18, %v1810_v3  ;;  %v805_v43 = vmul.f32 %v802_v18, %v1822_v13 }
 0x1f6   : > { %v2040_v62 = vsel %vm851_vm9, %v853_v57, %v855_v58  ;;  %v2043_v17 = vsel %vm851_vm9, %v852_v22, %v853_v57 }
 0x1f7   : > { %v2046_v30 = vsel %vm953_vm10, %v954_v37, %v955_v38  ;;  %v809_v0 = vrot.slane %v803_v35, 2  ;;  %v812_v56 = vrot.slane %v805_v43, 2  ;;  %v883_v37 = vstv %s1235_s26 }
 0x1f8   : > { %694 = vrot.lane.b32.xlu2 %v691_v27, %s2197_s25  ;;  %673 = vrot.lane.b32.xlu0 %v670_v5, %s1450_s19  ;;  %v762_v5 = vmul.f32 %v1829_v15, %v1810_v3  ;;  %v650_v27 = vrot.slane %v644_v32, 1  ;;  %v885_v4 = vmul.f32 %v883_v37, %v1810_v3 }
 0x1f9   : > { %692 = vrot.lane.b32.xlu1 %v689_v63, %s2197_s25  ;;  %v781_v63 = vstv %s1230_s17 }
 0x1fa   : > { %v2022_v50 = vsel %vm328_vm4, %v649_v12, %v650_v27  ;;  %v2027_v23 = vsel %vm328_vm4, %v650_v27, %v652_v51  ;;  %v2051_v51 = vsel %vm953_vm10, %v955_v38, %v957_v59  ;;  %v768_v58 = vrot.slane %v762_v5, 2 }
 0x1fb   : > { %v732_v59 = vrot.slane %v725_v55, 1  ;;  %v782_v49 = vmul.f32 %v781_v63, %v1808_v2  ;;  %v783_v11 = vmul.f32 %v781_v63, %v1810_v3  ;;  %v826_v27 = vmul.f32 %v823_v25, %v1822_v13 }
 0x1fc   : > { %v771_v48 = vsel %vm447_vm5, %v768_v58, %v770_v61  ;;  %v769_v15 = vsel %vm447_vm5, %v767_v6, %v768_v58  ;;  %v862_v55 = vstv %s1234_s29 }
 0x1fd   : > { %v733_v54 = vsel %vm328_vm4, %v730_v60, %v732_v59  ;;  %v784_v60 = vmul.f32 %v781_v63, %v1822_v13  ;;  %v788_v5 = vrot.slane %v782_v49, 2  ;;  %v789_v32 = vrot.slane %v783_v11, 2 }
 0x1fe   : > { %v833_v22 = vrot.slane %v826_v27, 2  ;;  %v863_v58 = vmul.f32 %v862_v55, %v1808_v2  ;;  %v864_v59 = vmul.f32 %v862_v55, %v1810_v3  ;;  %v865_v61 = vmul.f32 %v862_v55, %v1822_v13 }
 0x1ff   : > { %v791_v12 = vrot.slane %v784_v60, 2  ;;  %v790_v26 = vsel %vm447_vm5, %v788_v5, %v789_v32  ;;  %v886_v60 = vmul.f32 %v883_v37, %v1822_v13 }
 0x200   : > { %734 = vrot.lane.b32.xlu2 %v731_v7, %s1454_s0  ;;  %713 = vrot.lane.b32.xlu0 %v710_v41, %s1453_s6  ;;  %v810_v7 = vrot.slane %v804_v44, 2  ;;  %v824_v41 = vmul.f32 %v823_v25, %v1808_v2  ;;  %v834_v45 = vsel %vm447_vm5, %v831_v33, %v833_v22  ;;  %v869_v35 = vrot.slane %v863_v58, 3 }
 0x201   : > { %715 = vrot.lane.b32.xlu1 %v712_v31, %s1453_s6  ;;  %v792_v28 = vsel %vm447_vm5, %v789_v32, %v791_v12  ;;  %v884_v31 = vmul.f32 %v883_v37, %v1808_v2  ;;  %v870_v63 = vrot.slane %v864_v59, 3 }
 0x202   : > { %v811_v52 = vsel %vm447_vm5, %v809_v0, %v810_v7  ;;  %v830_v57 = vrot.slane %v824_v41, 2  ;;  %v813_v38 = vsel %vm447_vm5, %v810_v7, %v812_v56  ;;  %v893_v7 = vrot.slane %v886_v60, 3 }
 0x203   : > { %v890_v18 = vrot.slane %v884_v31, 3  ;;  %v871_v49 = vsel %vm851_vm9, %v869_v35, %v870_v63 }
 0x204   : > { %v832_v6 = vsel %vm447_vm5, %v830_v57, %v831_v33 }
 0x208   : > { %774 = vrot.lane.b32.xlu2 %v771_v48, %s1450_s19  ;;  %736 = vrot.lane.b32.xlu0 %v733_v54, %s1454_s0  ;;  %v891_v54 = vrot.slane %v885_v4, 3  ;;  %v872_v48 = vrot.slane %v865_v61, 3 }
 0x209   : > { %772 = vrot.lane.b32.xlu1 %v769_v15, %s1450_s19  ;;  %v907_v15 = vmul.f32 %v1841_v21, %v1822_v13  ;;  %v928_v21 = vmul.f32 %v1897_v36, %v1822_v13 }
 0x20a   : > { %v892_v44 = vsel %vm851_vm9, %v890_v18, %v891_v54  ;;  %v873_v11 = vsel %vm851_vm9, %v870_v63, %v872_v48  ;;  %v894_v32 = vsel %vm851_vm9, %v891_v54, %v893_v7 }
 0x20b   : > { %v914_v0 = vrot.slane %v907_v15, 3  ;;  %v935_v12 = vrot.slane %v928_v21, 3 }
 0x20d   : > { %v915_v5 = vsel %vm851_vm9, %v912_v10, %v914_v0  ;;  %v936_v8 = vsel %vm851_vm9, %v933_v46, %v935_v12  ;;  %v581_v46 = vmul.f32 %v580_v14, %v1808_v2 }
 0x210   : > { %814 = vrot.lane.b32.xlu2 %v811_v52, %s1453_s6  ;;  %793 = vrot.lane.b32.xlu0 %v790_v26, %s2197_s25 }
 0x211   : > { %795 = vrot.lane.b32.xlu1 %v792_v28, %s2197_s25 }
 0x218   : > { %837 = vrot.lane.b32.xlu2 %v834_v45, %s1454_s0  ;;  %816 = vrot.lane.b32.xlu0 %v813_v38, %s1453_s6 }
 0x219   : > { %835 = vrot.lane.b32.xlu1 %v832_v6, %s1454_s0 }
 0x220   : > { %895 = vrot.lane.b32.xlu2 %v892_v44, %s2197_s25  ;;  %874 = vrot.lane.b32.xlu0 %v871_v49, %s1450_s19 }
 0x221   : > { %876 = vrot.lane.b32.xlu1 %v873_v11, %s1450_s19 }
 0x228   : > { %918 = vrot.lane.b32.xlu2 %v915_v5, %s1453_s6  ;;  %897 = vrot.lane.b32.xlu0 %v894_v32, %s2197_s25 }
 0x229   : > { %916 = vrot.lane.b32.xlu1 %v1947_v20, %s1453_s6 }
 0x230   : > { %976 = vrot.lane.b32.xlu2 %v1950_v47, %s1450_s19  ;;  %937 = vrot.lane.b32.xlu0 %v1970_v42, %s1454_s0  ;;  %v582_v42 = vmul.f32 %v580_v14, %v1810_v3 }
 0x231   : > { %939 = vrot.lane.b32.xlu1 %v936_v8, %s1454_s0 }
 0x238   : > { %999 = vrot.lane.b32.xlu2 %v1975_v16, %s2197_s25  ;;  %978 = vrot.lane.b32.xlu0 %v1956_v34, %s1450_s19  ;;  %v578_v34 = vstv %s1217_s3  ;;  %s1198_s19 = sshll.u32 %s1573_s4, 4 }
 0x239   : > { %997 = vrot.lane.b32.xlu1 %v1979_v1, %s2197_s25  ;;  %v583_v16 = vadd.f32 %v581_v46, %v578_v34  ;;  %v584_v1 = vadd.f32 %v582_v42, %v578_v34  ;;  %s177_s13 = scalar_lea.vmem [#allocation10], %s1198_s19  ;;  %s1387_s25 = sshra.s32 %s1103_s5, 4  ;;  %s1388_s25 = int_to_ptr.hbm [resolvable:$true] %s1387_s25 }
 0x23a   : > { %v606_v13 = vpop.permute.xlu2 %605  ;;  %s1100_s28 = sshll.u32 %s177_s13, 4  ;;  %s1389_s30 = scalar_lea.hbm %s1388_s25, 16  ;;  %s1101_s28 = int_to_ptr.vmem [resolvable:$true] %s1100_s28 }
 0x23b   : > { %p1390_p4 = scmp.ne.s32.totalorder %s1388_s25, %s1389_s30  ;;  %p1394_p0 = scmp.lt.s32.totalorder %s1388_s25, %s2186_s2 }
 0x23c   : > { %p1395_p3 = scmp.lt.s32.totalorder %s1393_s16, %s1389_s30 }
 0x23d   : > { %p1391_p6 = pnand %p1390_p4, %p1524_p11 }
 0x23e   : > { %p1396_p5 = por %p1395_p3, %p1394_p0 }
 0x23f   : > { %p1392_p13 = pneg %p1391_p6 }
 0x240   : > { %1039 = vrot.lane.b32.xlu2 %v1985_v19, %s1454_s0  ;;  %1018 = vrot.lane.b32.xlu0 %v1999_v9, %s1453_s6 }
 0x241   : > { %1020 = vrot.lane.b32.xlu1 %v2004_v29, %s1453_s6  ;;  %p1397_p8 = pnand %p1396_p5, %p1392_p13 }
 0x242   : > { %v622_v36 = vpop.permute.xlu2 %621 }
 0x248   : > { %1041 = vrot.lane.b32.xlu0 %v1990_v39, %s1454_s0 }
 0x24a   : > { %v672_v10 = vpop.permute.xlu2 %671 }
 0x252   : > { %v592_v20 = vpop.permute.xlu0 %591  ;;  %v695_v19 = vpop.permute.xlu2 %694 }
 0x253   : > { %v594_v47 = vpop.permute.xlu1 %593  ;;  %v597_v29 = vadd.f32 %v592_v20, %v583_v16 }
 0x254   : > { %v598_v52 = vadd.f32 %v594_v47, %v584_v1 }
 0x255   : > { %v611_v39 = vadd.f32 %v606_v13, %v597_v29 }
 0x25a   : > { %v608_v9 = vpop.permute.xlu0 %607  ;;  %v735_v33 = vpop.permute.xlu2 %734 }
 0x25b   : > { %v620_v25 = vpop.permute.xlu1 %619  ;;  %v612_v26 = vadd.f32 %v608_v9, %v598_v52 }
 0x25c   : > { %v625_v40 = vadd.f32 %v620_v25, %v611_v39 }
 0x25d   : > { %v626_v28 = vadd.f32 %v622_v36, %v612_v26 }
 0x262   : > { %v634_v43 = vpop.permute.xlu0 %633  ;;  %v775_v37 = vpop.permute.xlu2 %774 }
 0x263   : > { %v636_v41 = vpop.permute.xlu1 %635  ;;  %v639_v27 = vadd.f32 %v634_v43, %v625_v40 }
 0x264   : > { %v640_v56 = vadd.f32 %v636_v41, %v626_v28 }
 0x265   : > { %v656_v2 = vadd.f32 %v2022_v50, %v639_v27 }
 0x266   : > { %v657_v3 = vadd.f32 %v2027_v23, %v640_v56 }
 0x267   : > { %v677_v38 = vadd.f32 %v672_v10, %v656_v2 }
 0x26a   : > { %v674_v57 = vpop.permute.xlu0 %673  ;;  %v815_v18 = vpop.permute.xlu2 %814 }
 0x26b   : > { %v693_v22 = vpop.permute.xlu1 %692  ;;  %v678_v45 = vadd.f32 %v674_v57, %v657_v3 }
 0x26c   : > { %v698_v31 = vadd.f32 %v693_v22, %v677_v38 }
 0x26d   : > { %v699_v6 = vadd.f32 %v695_v19, %v678_v45 }
 0x272   : > { %v714_v55 = vpop.permute.xlu0 %713  ;;  %v838_v48 = vpop.permute.xlu2 %837 }
 0x273   : > { %v716_v4 = vpop.permute.xlu1 %715  ;;  %v719_v58 = vadd.f32 %v714_v55, %v698_v31 }
 0x274   : > { %v720_v54 = vadd.f32 %v716_v4, %v699_v6 }
 0x275   : > { %v740_v59 = vadd.f32 %v735_v33, %v719_v58 }
 0x277   : > { %v757_v61 = vadd.f32 %v2030_v24, %v740_v59 }
 0x27a   : > { %v737_v35 = vpop.permute.xlu0 %736  ;;  %v896_v12 = vpop.permute.xlu2 %895 }
 0x27b   : > { %v773_v63 = vpop.permute.xlu1 %772  ;;  %v741_v50 = vadd.f32 %v737_v35, %v720_v54 }
 0x27c   : > { %v778_v11 = vadd.f32 %v773_v63, %v757_v61 }
 0x27d   : > { %v758_v23 = vadd.f32 %v2035_v53, %v741_v50 }
 0x27f   : > { %v779_v60 = vadd.f32 %v775_v37, %v758_v23 }
 0x282   : > { %v794_v44 = vpop.permute.xlu0 %793  ;;  %v919_v14 = vpop.permute.xlu2 %918 }
 0x283   : > { %v796_v49 = vpop.permute.xlu1 %795  ;;  %v799_v15 = vadd.f32 %v794_v44, %v778_v11 }
 0x284   : > { %v800_v0 = vadd.f32 %v796_v49, %v779_v60 }
 0x285   : > { %v820_v7 = vadd.f32 %v815_v18, %v799_v15 }
 0x28a   : > { %v817_v5 = vpop.permute.xlu0 %816  ;;  %v977_v1 = vpop.permute.xlu2 %976 }
 0x28b   : > { %v836_v32 = vpop.permute.xlu1 %835  ;;  %v821_v21 = vadd.f32 %v817_v5, %v800_v0 }
 0x28c   : > { %v841_v24 = vadd.f32 %v836_v32, %v820_v7 }
 0x28d   : > { %v842_v8 = vadd.f32 %v838_v48, %v821_v21 }
 0x28e   : > { %v859_v13 = vadd.f32 %v2043_v17, %v841_v24 }
 0x28f   : > { %v860_v36 = vadd.f32 %v2040_v62, %v842_v8 }
 0x292   : > { %v875_v10 = vpop.permute.xlu0 %874  ;;  %v1000_v39 = vpop.permute.xlu2 %999 }
 0x293   : > { %v877_v53 = vpop.permute.xlu1 %876  ;;  %v880_v47 = vadd.f32 %v875_v10, %v859_v13 }
 0x294   : > { %v881_v34 = vadd.f32 %v877_v53, %v860_v36 }
 0x295   : > { %v901_v16 = vadd.f32 %v896_v12, %v880_v47 }
 0x29a   : > { %v898_v20 = vpop.permute.xlu0 %897  ;;  %v1040_v2 = vpop.permute.xlu2 %1039 }
 0x29b   : > { %v917_v46 = vpop.permute.xlu1 %916  ;;  %v902_v42 = vadd.f32 %v898_v20, %v881_v34 }
 0x29c   : > { %v922_v19 = vadd.f32 %v917_v46, %v901_v16 }
 0x29d   : > { %v923_v9 = vadd.f32 %v919_v14, %v902_v42 }
 0x2a2   : > { %v938_v29 = vpop.permute.xlu0 %937 }
 0x2a3   : > { %v940_v25 = vpop.permute.xlu1 %939  ;;  %v943_v52 = vadd.f32 %v938_v29, %v922_v19 }
 0x2a4   : > { %v944_v26 = vadd.f32 %v940_v25, %v923_v9 }
 0x2a5   : > { %v961_v17 = vadd.f32 %v2046_v30, %v943_v52 }
 0x2a6   : > { %v962_v62 = vadd.f32 %v2051_v51, %v944_v26 }
 0x2a7   : > { %v982_v43 = vadd.f32 %v977_v1, %v961_v17 }
 0x2aa   : > { %v979_v40 = vpop.permute.xlu0 %978 }
 0x2ab   : > { %v998_v28 = vpop.permute.xlu1 %997  ;;  %v983_v33 = vadd.f32 %v979_v40, %v962_v62 }
 0x2ac   : > { %v1003_v41 = vadd.f32 %v998_v28, %v982_v43 }
 0x2ad   : > { %v1004_v22 = vadd.f32 %v1000_v39, %v983_v33 }
 0x2b2   : > { %v1019_v27 = vpop.permute.xlu0 %1018 }
 0x2b3   : > { %v1024_v56 = vadd.f32 %v1019_v27, %v1003_v41  ;;  %v1021_v57 = vpop.permute.xlu1 %1020 }
 0x2b4   : > { %v1025_v38 = vadd.f32 %v1021_v57, %v1004_v22 }
 0x2b5   : > { %v1045_v3 = vadd.f32 %v1040_v2, %v1024_v56 }
 0x2b7   : > { %v1243_v37 = vmul.f32 -1.442695, %v1045_v3 }
 0x2b9   : > { %1320 = vpow2.f32 %v1243_v37 }
 0x2ba   : > { %v1042_v31 = vpop.permute.xlu0 %1041 }
 0x2bb   : > { %v1046_v30 = vadd.f32 %v1042_v31, %v1025_v38 }
 0x2bd   : > { %v1244_v55 = vmul.f32 -1.442695, %v1046_v30 }
 0x2bf   : > { %v1321_v51 = vpop.eup %1320  ;;  %1322 = vpow2.f32 %v1244_v55 }
 0x2c0   : > { %v1053_v45 = vadd.f32 1.0, %v1321_v51 }
 0x2c2   : > { %1324 = vrcp.f32 %v1053_v45  ;;  %v1066_v18 = vand.u32 2147483648, %v1053_v45  ;;  %v1064_v35 = vand.u32 2147483647, %v1053_v45  ;;  %vm1060_vm12 = vweird.f32 %v1053_v45 }
 0x2c4   : > { %v1067_v48 = vor.u32 1.1754944e-38, %v1066_v18  ;;  %vm1065_vm14 = vcmp.eq.f32.partialorder %v1064_v35, 8.507059e+37 }
 0x2c5   : > { %v1323_v4 = vpop.eup %1322 }
 0x2c6   : > { %v1054_v58 = vadd.f32 1.0, %v1323_v4 }
 0x2c8   : > { %v1325_v59 = vpop.eup %1324  ;;  %1326 = vrcp.f32 %v1054_v58  ;;  %v1081_v11 = vand.u32 2147483648, %v1054_v58  ;;  %v1079_v0 = vand.u32 2147483647, %v1054_v58  ;;  %vm1075_vm1 = vweird.f32 %v1054_v58 }
 0x2c9   : > { %v1056_v6 = vmul.f32 %v1325_v59, %v1053_v45  ;;  %vm1061_vm11 = vweird.f32 %v1325_v59 }
 0x2ca   : > { %vm1062_vm13 = vmor %vm1060_vm12, %vm1061_vm11  ;;  %v1082_v5 = vor.u32 1.1754944e-38, %v1081_v11  ;;  %vm1080_vm3 = vcmp.eq.f32.partialorder %v1079_v0, 8.507059e+37 }
 0x2cb   : > { %v1057_v61 = vsub.f32 1.0, %v1056_v6 }
 0x2cd   : > { %v1058_v54 = vmul.f32 %v1325_v59, %v1057_v61 }
 0x2ce   : > { %v1327_v63 = vpop.eup %1326 }
 0x2cf   : > { %v1071_v50 = vmul.f32 %v1327_v63, %v1054_v58  ;;  %v1059_v23 = vadd.f32 %v1325_v59, %v1058_v54  ;;  %vm1076_vm15 = vweird.f32 %v1327_v63 }
 0x2d0   : > { %vm1077_vm2 = vmor %vm1075_vm1, %vm1076_vm15 }
 0x2d1   : > { %v1072_v44 = vsub.f32 1.0, %v1071_v50  ;;  %v1063_v49 = vsel %vm1062_vm13, %v1325_v59, %v1059_v23 }
 0x2d2   : > { %v1068_v15 = vsel %vm1065_vm14, %v1067_v48, %v1063_v49 }
 0x2d3   : > { %v1073_v60 = vmul.f32 %v1327_v63, %v1072_v44  ;;  %1085 = vst.msk [vmem:[%s177_s13] sm:$0xff] %vm186_vm0, %v1068_v15 }
 0x2d5   : > { %v1074_v7 = vadd.f32 %v1327_v63, %v1073_v60 }
 0x2d7   : > { %v1078_v32 = vsel %vm1077_vm2, %v1327_v63, %v1074_v7 }
 0x2d8   : > { %v1083_v21 = vsel %vm1080_vm3, %v1082_v5, %v1078_v32 }
 0x2d9   : > { %1086 = vst.msk [vmem:[%s177_s13 + $0x8] sm:$0xff] %vm186_vm0, %v1083_v21 }
 0x2da   : > { %1400 = shalt.err (!%p1397_p8)
}
 0x2db   : > { %s1455_s4 = smov 128   ;;  %s1456_s26 = smov 8  }
 0x2dc   : > { %1258 = dma.vmem_to_hbm [thread:$0]  (%p1524_p11), %s1101_s28, 256, %s1103_s5, %s1088_s14, %s1455_s4, %s1455_s4, %s1456_s26  }
 0x2dd PF: > { %s1117_s29 = sand.u32 1, %s1431_s9   ;;  %p2198_p9 = scmp.ge.s32.totalorder %s1443_s12, 2 }
 0x2de   : > { %s1118_s27 = scalar_lea.sflag [#allocation7], %s1117_s29 }
 0x2df   : > { %p1269_p10 = pnand %p2198_p9, %p1528_p12 }
 0x2e1   : > { %p1270_p1 = pneg %p1269_p10 }
 0x2e3   : > { %1426 = dma.done.wait (%p1270_p1), %s1118_s27, 256  }
 0x2e4   : > { %1428 = vsyncadd (%p1270_p1), %s1118_s27, 4294967040  ;;  %p16_p2 = scmp.ge.s32.totalorder %s1497_s15, 4   ;;  %s2199_s9 = smov %s1435_s10 }
 0x2e5   : > { %s2200_s10 = smov %s1439_s11  ;;  %s2201_s11 = smov %s1509_s18 }
 0x2e6   : > { %s2202_s12 = smov %s1497_s15  ;;  %18 = sbr.rel (!%p16_p2) target bundleno = 8 (0x8), region = 78 }
 0x2eb   :  { %1124 = vsyncpa [#allocation6], 1 }
 0x2ec   :  { %1126 = vsyncpa [#allocation6 + $0x1], 1 }
 0x2ed   :  { %1127 = vsyncpa [#allocation7], 1 }
 0x2ee   :  { %1129 = vsyncpa [#allocation7 + $0x1], 1 }
 0x2ef   :  { %1130 = vsyncpa [#allocation8], 1 }
 0x2f0   :  { %1132 = vsyncpa [#allocation8 + $0x1], 1 }

</bundles_post_ra>
